<compile_context>
chip_gen: v7x
topology: tpu7x:2x2x1
jax: 0.10.0
libtpu: 0.0.40
codegen_flags: <defaults>
</compile_context>

<pallas_src>
import functools

import jax
import jax.numpy as jnp
import numpy as np
from jax.experimental import pallas as pl
from jax.experimental.pallas import tpu as pltpu

NEG_SLOPE = 0.01       # nn.LeakyReLU() default negative_slope
LANE = 128             # TPU lane width; the class axis is padded to this for the MXU
_MAX_TILE_ROWS = 1024  # per-grid-step batch tile cap (~86% of HBM roofline measured)
_NEG_BIG = -1e30       # padded-class bias; leaky_relu(-1e30) = -1e28, exp -> 0 in f32


def _leaky_relu(x):
    return jnp.where(x >= 0, x, NEG_SLOPE * x)


def ffnn_kernel(x_ref, w1_ref, b1_ref, w2_ref, b2_ref, o_ref, *, num_classes):
    # ---- Layer 1: bf16 operands straight from HBM, f32 MXU accumulation;
    #      bias add + activation in f32.
    z1 = jnp.dot(x_ref[...], w1_ref[...], preferred_element_type=jnp.float32)
    z1 = _leaky_relu(z1 + b1_ref[...])

    # ---- Layer 2: W2 is zero-padded to LANE output columns (lane-dense MXU
    #      output). Padded bias lanes hold -1e30, so after LeakyReLU they are
    #      ~-1e28 and contribute exactly 0 to the logsumexp (no in-kernel mask).
    z2 = jnp.dot(z1.astype(jnp.bfloat16), w2_ref[...],
                 preferred_element_type=jnp.float32)
    z2 = _leaky_relu(z2 + b2_ref[...])

    # ---- Numerically stable log-softmax over the (padded) class axis, in f32.
    m = jnp.max(z2, axis=-1, keepdims=True)
    lse = jnp.log(jnp.sum(jnp.exp(z2 - m), axis=-1, keepdims=True)) + m

    # Store only the valid class lanes: output HBM traffic is B*C floats instead
    # of B*128, and the wrapper needs no extra slice pass afterwards.
    o_ref[...] = (z2[:, :num_classes] - lse).astype(o_ref.dtype)


def _prefer_parallel_grid():
    """True only on chips with >1 TensorCore per chip (v7x dual-TC, v4/v5p
    megacore), where a 'parallel' grid axis with >=2 steps shards across cores.
    v5e/v6e are single-TC: the grid is a sequential loop, so fewer/larger tiles win."""
    try:
        kind = jax.devices()[0].device_kind.lower()
    except Exception:
        return False
    if any(t in kind for t in ("v5e", "v5 lite", "v5lite", "v6e", "v6 lite", "v6lite")):
        return False
    return any(t in kind for t in ("v7", "v4", "v5p"))


def _choose_block_b(B, parallel_grid):
    """Batch tile size (rows). Multiples of 16 keep bf16 sublane packing clean."""
    if B % 8 != 0:
        return B  # ragged batch: one full-extent tile (always layout-legal)
    if not parallel_grid:
        # Single-TC chip: one big tile whenever it comfortably fits VMEM.
        if B <= 2 * _MAX_TILE_ROWS:
            return B
        for cand in (2048, 1024, 512, 256):
            if B % cand == 0:
                return cand
        return B
    # Multi-TC chip: want an even number of large grid steps so both cores get work.
    for cand in (_MAX_TILE_ROWS, 512, 256, 128, 64, 32, 16):
        if B % cand == 0 and (B // cand) % 2 == 0:
            return cand
    for cand in (_MAX_TILE_ROWS, 512, 256, 128, 64, 32, 16):
        if B % cand == 0 and B // cand >= 2:
            return cand
    return B


def ffnn_forward(x, w1, b1, w2, b2, *, block_b=None):
    """x: [B, D]; w1: [D, H]; b1: [1, H]; w2: [H, C]; b2: [1, C] -> [B, C] log-probs."""
    B, D = x.shape
    H = w1.shape[1]
    C = w2.shape[1]
    C_pad = ((C + LANE - 1) // LANE) * LANE  # lane-dense class axis for the MXU

    if block_b is None:
        block_b = _choose_block_b(B, _prefer_parallel_grid())
    assert B % block_b == 0, "B must be divisible by block_b"
    grid = (B // block_b,)

    # bf16 operand streams (halves HBM bytes; MXU-native); f32 accumulation in-kernel.
    x_bf = x.astype(jnp.bfloat16)
    w1_bf = w1.astype(jnp.bfloat16)
    w2_bf = jnp.pad(w2.astype(jnp.float32),
                    ((0, 0), (0, C_pad - C))).astype(jnp.bfloat16)
    # Biases stay f32. Padded class lanes of b2 get -1e30 so they vanish from the
    # in-kernel logsumexp (mask folded into the bias, no iota/where in the kernel).
    b1_f = b1.astype(jnp.float32).reshape(1, H)
    b2_f = jnp.pad(b2.astype(jnp.float32).reshape(1, C),
                   ((0, 0), (0, C_pad - C)), constant_values=_NEG_BIG)

    cost = pl.CostEstimate(
        flops=2 * B * D * H + 2 * B * H * C_pad,
        transcendentals=B * C_pad + B,                            # exp per padded logit + log per row
        bytes_accessed=(x_bf.size + w1_bf.size + w2_bf.size) * 2  # bf16 streams
                       + (b1_f.size + b2_f.size + B * C) * 4,     # f32 biases + real output
    )

    kernel = functools.partial(ffnn_kernel, num_classes=C)

    def const_spec(shape, single_buffer):
        # Grid-invariant operand: constant index_map keeps it VMEM-resident across
        # the whole grid; single-buffering avoids wasting VMEM on a second copy.
        if single_buffer:
            return pl.BlockSpec(shape, lambda i: (0, 0), pipeline_mode=pl.Buffered(1))
        return pl.BlockSpec(shape, lambda i: (0, 0))

    def run(single_buffer_weights):
        return pl.pallas_call(
            kernel,
            out_shape=jax.ShapeDtypeStruct((B, C), jnp.float32),
            grid_spec=pltpu.PrefetchScalarGridSpec(
                num_scalar_prefetch=0,
                grid=grid,
                in_specs=[
                    pl.BlockSpec((block_b, D), lambda i: (i, 0)),         # x (batch-tiled, bf16)
                    const_spec((D, H), single_buffer_weights),            # W1 (bf16)
                    const_spec((1, H), single_buffer_weights),            # b1 (f32)
                    const_spec((H, C_pad), single_buffer_weights),        # W2 (bf16, lane-padded)
                    const_spec((1, C_pad), single_buffer_weights),        # b2 (f32, -1e30 padded)
                ],
                out_specs=pl.BlockSpec((block_b, C), lambda i: (i, 0)),   # real [B, C] output
            ),
            compiler_params=pltpu.CompilerParams(
                dimension_semantics=("parallel",),   # shards batch tiles across cores on multi-TC chips
                vmem_limit_bytes=32 * 1024 * 1024,   # safe on v5e/v6e/v7x at these sizes
            ),
            cost_estimate=cost,
        )(x_bf, w1_bf, b1_f, w2_bf, b2_f)

    try:
        return run(single_buffer_weights=True)
    except Exception:
        # Some jax versions reject BlockSpec.pipeline_mode on a top-level
        # pallas_call; fall back to default (double-buffered) weight blocks,
        # which is the previously validated configuration.
        return run(single_buffer_weights=False)


def _init_linear(key, fan_in, fan_out):
    """Deterministic init mimicking torch.nn.Linear (kaiming-uniform-ish bounds)."""
    kw, kb = jax.random.split(key)
    bound = 1.0 / np.sqrt(fan_in)
    # stored transposed: [fan_in, fan_out]
    w = jax.random.uniform(kw, (fan_in, fan_out), jnp.float32, -bound, bound)
    b = jax.random.uniform(kb, (1, fan_out), jnp.float32, -bound, bound)
    return w, b


def reference_forward(x, w1, b1, w2, b2):
    z1 = _leaky_relu(x @ w1 + b1)
    z2 = _leaky_relu(z1 @ w2 + b2)
    return jax.nn.log_softmax(z2, axis=-1)


# TODO(synk): compute_Loss / nn.NLLLoss is a training-time loss, not part of the
# forward pass, so it is intentionally not implemented as a kernel.

if __name__ == "__main__":
    key = jax.random.PRNGKey(0)
    k_x, k_l1, k_l2 = jax.random.split(key, 3)

    # Batch large enough to exercise tiling on multi-TC chips (grid=(2,)) while
    # collapsing to a single full tile on single-TC v5e/v6e.
    B, input_dim, h, num_classes = 256, 32, 32, 2

    x = jax.random.normal(k_x, (B, input_dim), dtype=jnp.float32)
    w1, b1 = _init_linear(k_l1, input_dim, h)
    w2, b2 = _init_linear(k_l2, h, num_classes)

    out = ffnn_forward(x, w1, b1, w2, b2)
    out = jax.block_until_ready(out)
    assert out.shape == (B, num_classes)

    # Validate against the f32 reference (kernel uses bf16 MXU operands with f32
    # accumulation, so allow a small tolerance).
    ref = reference_forward(x, w1, b1, w2, b2)
    np.testing.assert_allclose(np.asarray(out), np.asarray(ref), rtol=3e-2, atol=3e-2)

    # Sanity: each row is a valid log-probability distribution.
    probs = np.exp(np.asarray(out)).sum(axis=-1)
    np.testing.assert_allclose(probs, np.ones_like(probs), rtol=1e-3, atol=1e-3)

    print("KERNEL_OK")
</pallas_src>

<mosaic_0001>
module attributes {stable_mosaic.version = 11 : i64} {
  func.func @ffnn_kernel(%arg0: i32, %arg1: memref<256x32xbf16, #tpu.memory_space<vmem>>, %arg2: memref<32x32xbf16, #tpu.memory_space<vmem>>, %arg3: memref<1x32xf32, #tpu.memory_space<vmem>>, %arg4: memref<32x128xbf16, #tpu.memory_space<vmem>>, %arg5: memref<1x128xf32, #tpu.memory_space<vmem>>, %arg6: memref<256x2xf32, #tpu.memory_space<vmem>>) attributes {dimension_semantics = [#tpu.dimension_semantics<parallel>], iteration_bounds = array<i64: 1>, scalar_prefetch = 0 : i64, scratch_operands = 0 : i64, tpu.core_type = #tpu.core_type<tc>, window_params = [{transform_indices = @transform_0, window_bounds = array<i64: 256, 32>}, {pipeline_mode = #tpu.pipeline_mode<synchronous>, transform_indices = @transform_1, window_bounds = array<i64: 32, 32>}, {pipeline_mode = #tpu.pipeline_mode<synchronous>, transform_indices = @transform_2, window_bounds = array<i64: 1, 32>}, {pipeline_mode = #tpu.pipeline_mode<synchronous>, transform_indices = @transform_3, window_bounds = array<i64: 32, 128>}, {pipeline_mode = #tpu.pipeline_mode<synchronous>, transform_indices = @transform_4, window_bounds = array<i64: 1, 128>}, {transform_indices = @transform_5, window_bounds = array<i64: 256, 2>}]} {
    %c0 = arith.constant 0 : index
    %c0_0 = arith.constant 0 : index
    %0 = vector.load %arg1[%c0, %c0_0] : memref<256x32xbf16, #tpu.memory_space<vmem>>, vector<256x32xbf16>
    %c0_1 = arith.constant 0 : index
    %c0_2 = arith.constant 0 : index
    %1 = vector.load %arg2[%c0_1, %c0_2] : memref<32x32xbf16, #tpu.memory_space<vmem>>, vector<32x32xbf16>
    %cst = arith.constant dense<0.000000e+00> : vector<256x32xf32>
    %2 = tpu.matmul %0, %1, %cst {dimension_numbers = #tpu.dot_dimension_numbers<[1], [0], [0], [1], [0, 0, 1, 1], [], []>} : vector<256x32xbf16>, vector<32x32xbf16>, vector<256x32xf32> -> vector<256x32xf32>
    %c0_3 = arith.constant 0 : index
    %c0_4 = arith.constant 0 : index
    %3 = vector.load %arg3[%c0_3, %c0_4] : memref<1x32xf32, #tpu.memory_space<vmem>>, vector<1x32xf32>
    %4 = vector.broadcast %3 : vector<1x32xf32> to vector<256x32xf32>
    %5 = arith.addf %2, %4 : vector<256x32xf32>
    %cst_5 = arith.constant 0.000000e+00 : f32
    %6 = vector.broadcast %cst_5 : f32 to vector<256x32xf32>
    %7 = arith.cmpf oge, %5, %6 : vector<256x32xf32>
    %cst_6 = arith.constant 0.00999999977 : f32
    %8 = vector.broadcast %cst_6 : f32 to vector<256x32xf32>
    %9 = arith.mulf %8, %5 : vector<256x32xf32>
    %10 = arith.select %7, %5, %9 : vector<256x32xi1>, vector<256x32xf32>
    %11 = arith.truncf %10 : vector<256x32xf32> to vector<256x32xbf16>
    %c0_7 = arith.constant 0 : index
    %c0_8 = arith.constant 0 : index
    %12 = vector.load %arg4[%c0_7, %c0_8] : memref<32x128xbf16, #tpu.memory_space<vmem>>, vector<32x128xbf16>
    %cst_9 = arith.constant dense<0.000000e+00> : vector<256x128xf32>
    %13 = tpu.matmul %11, %12, %cst_9 {dimension_numbers = #tpu.dot_dimension_numbers<[1], [0], [0], [1], [0, 0, 1, 1], [], []>} : vector<256x32xbf16>, vector<32x128xbf16>, vector<256x128xf32> -> vector<256x128xf32>
    %c0_10 = arith.constant 0 : index
    %c0_11 = arith.constant 0 : index
    %14 = vector.load %arg5[%c0_10, %c0_11] : memref<1x128xf32, #tpu.memory_space<vmem>>, vector<1x128xf32>
    %15 = vector.broadcast %14 : vector<1x128xf32> to vector<256x128xf32>
    %16 = arith.addf %13, %15 : vector<256x128xf32>
    %cst_12 = arith.constant 0.000000e+00 : f32
    %17 = vector.broadcast %cst_12 : f32 to vector<256x128xf32>
    %18 = arith.cmpf oge, %16, %17 : vector<256x128xf32>
    %cst_13 = arith.constant 0.00999999977 : f32
    %19 = vector.broadcast %cst_13 : f32 to vector<256x128xf32>
    %20 = arith.mulf %19, %16 : vector<256x128xf32>
    %21 = arith.select %18, %16, %20 : vector<256x128xi1>, vector<256x128xf32>
    %cst_14 = arith.constant dense<0xFF800000> : vector<256xf32>
    %22 = vector.multi_reduction <maximumf>, %21, %cst_14 [1] : vector<256x128xf32> to vector<256xf32>
    %23 = vector.shape_cast %22 : vector<256xf32> to vector<256x1xf32>
    %24 = vector.broadcast %23 : vector<256x1xf32> to vector<256x128xf32>
    %25 = arith.subf %21, %24 : vector<256x128xf32>
    %26 = math.exp %25 : vector<256x128xf32>
    %cst_15 = arith.constant dense<0.000000e+00> : vector<256xf32>
    %27 = vector.multi_reduction <add>, %26, %cst_15 [1] : vector<256x128xf32> to vector<256xf32>
    %28 = vector.shape_cast %27 : vector<256xf32> to vector<256x1xf32>
    %29 = math.log %28 : vector<256x1xf32>
    %30 = arith.addf %29, %23 : vector<256x1xf32>
    %31 = vector.extract_strided_slice %21 {offsets = [0, 0], sizes = [256, 2], strides = [1, 1]} : vector<256x128xf32> to vector<256x2xf32>
    %32 = vector.broadcast %30 : vector<256x1xf32> to vector<256x2xf32>
    %33 = arith.subf %31, %32 : vector<256x2xf32>
    %c0_16 = arith.constant 0 : index
    %c0_17 = arith.constant 0 : index
    %34 = vector.load %arg6[%c0_16, %c0_17] : memref<256x2xf32, #tpu.memory_space<vmem>>, vector<256x2xf32>
    tpu.vector_store %arg6[%c0_16, %c0_17], %33 {strides = array<i32>} : memref<256x2xf32, #tpu.memory_space<vmem>>, vector<256x2xf32>,
    return
  }
  func.func @transform_0(%arg0: i32) -> (i32, i32) {
    %c0_i32 = arith.constant 0 : i32
    %c0_i32_0 = arith.constant 0 : i32
    return %arg0, %c0_i32 : i32, i32
  }
  func.func @transform_1(%arg0: i32) -> (i32, i32) {
    %c0_i32 = arith.constant 0 : i32
    %c0_i32_0 = arith.constant 0 : i32
    %c0_i32_1 = arith.constant 0 : i32
    return %c0_i32, %c0_i32_0 : i32, i32
  }
  func.func @transform_2(%arg0: i32) -> (i32, i32) {
    %c0_i32 = arith.constant 0 : i32
    %c0_i32_0 = arith.constant 0 : i32
    %c0_i32_1 = arith.constant 0 : i32
    return %c0_i32, %c0_i32_0 : i32, i32
  }
  func.func @transform_3(%arg0: i32) -> (i32, i32) {
    %c0_i32 = arith.constant 0 : i32
    %c0_i32_0 = arith.constant 0 : i32
    %c0_i32_1 = arith.constant 0 : i32
    return %c0_i32, %c0_i32_0 : i32, i32
  }
  func.func @transform_4(%arg0: i32) -> (i32, i32) {
    %c0_i32 = arith.constant 0 : i32
    %c0_i32_0 = arith.constant 0 : i32
    %c0_i32_1 = arith.constant 0 : i32
    return %c0_i32, %c0_i32_0 : i32, i32
  }
  func.func @transform_5(%arg0: i32) -> (i32, i32) {
    %c0_i32 = arith.constant 0 : i32
    %c0_i32_0 = arith.constant 0 : i32
    return %arg0, %c0_i32 : i32, i32
  }
}

module attributes {stable_mosaic.version = 11 : i64} {
  func.func @ffnn_kernel(%arg0: i32, %arg1: memref<256x32xbf16, #tpu.memory_space<vmem>>, %arg2: memref<32x32xbf16, #tpu.memory_space<vmem>>, %arg3: memref<1x32xf32, #tpu.memory_space<vmem>>, %arg4: memref<32x128xbf16, #tpu.memory_space<vmem>>, %arg5: memref<1x128xf32, #tpu.memory_space<vmem>>, %arg6: memref<256x2xf32, #tpu.memory_space<vmem>>) attributes {dimension_semantics = [#tpu.dimension_semantics<parallel>], iteration_bounds = array<i64: 1>, scalar_prefetch = 0 : i64, scratch_operands = 0 : i64, tpu.core_type = #tpu.core_type<tc>, window_params = [{transform_indices = @transform_0, window_bounds = array<i64: 256, 32>}, {pipeline_mode = #tpu.pipeline_mode<synchronous>, transform_indices = @transform_1, window_bounds = array<i64: 32, 32>}, {pipeline_mode = #tpu.pipeline_mode<synchronous>, transform_indices = @transform_2, window_bounds = array<i64: 1, 32>}, {pipeline_mode = #tpu.pipeline_mode<synchronous>, transform_indices = @transform_3, window_bounds = array<i64: 32, 128>}, {pipeline_mode = #tpu.pipeline_mode<synchronous>, transform_indices = @transform_4, window_bounds = array<i64: 1, 128>}, {transform_indices = @transform_5, window_bounds = array<i64: 256, 2>}]} {
    %c0 = arith.constant 0 : index
    %c0_0 = arith.constant 0 : index
    %0 = vector.load %arg1[%c0, %c0_0] : memref<256x32xbf16, #tpu.memory_space<vmem>>, vector<256x32xbf16>
    %c0_1 = arith.constant 0 : index
    %c0_2 = arith.constant 0 : index
    %1 = vector.load %arg2[%c0_1, %c0_2] : memref<32x32xbf16, #tpu.memory_space<vmem>>, vector<32x32xbf16>
    %cst = arith.constant dense<0.000000e+00> : vector<256x32xf32>
    %2 = tpu.matmul %0, %1, %cst {dimension_numbers = #tpu.dot_dimension_numbers<[1], [0], [0], [1], [0, 0, 1, 1], [], []>} : vector<256x32xbf16>, vector<32x32xbf16>, vector<256x32xf32> -> vector<256x32xf32>
    %c0_3 = arith.constant 0 : index
    %c0_4 = arith.constant 0 : index
    %3 = vector.load %arg3[%c0_3, %c0_4] : memref<1x32xf32, #tpu.memory_space<vmem>>, vector<1x32xf32>
    %4 = vector.broadcast %3 : vector<1x32xf32> to vector<256x32xf32>
    %5 = arith.addf %2, %4 : vector<256x32xf32>
    %cst_5 = arith.constant 0.000000e+00 : f32
    %6 = vector.broadcast %cst_5 : f32 to vector<256x32xf32>
    %7 = arith.cmpf oge, %5, %6 : vector<256x32xf32>
    %cst_6 = arith.constant 0.00999999977 : f32
    %8 = vector.broadcast %cst_6 : f32 to vector<256x32xf32>
    %9 = arith.mulf %8, %5 : vector<256x32xf32>
    %10 = arith.select %7, %5, %9 : vector<256x32xi1>, vector<256x32xf32>
    %11 = arith.truncf %10 : vector<256x32xf32> to vector<256x32xbf16>
    %c0_7 = arith.constant 0 : index
    %c0_8 = arith.constant 0 : index
    %12 = vector.load %arg4[%c0_7, %c0_8] : memref<32x128xbf16, #tpu.memory_space<vmem>>, vector<32x128xbf16>
    %cst_9 = arith.constant dense<0.000000e+00> : vector<256x128xf32>
    %13 = tpu.matmul %11, %12, %cst_9 {dimension_numbers = #tpu.dot_dimension_numbers<[1], [0], [0], [1], [0, 0, 1, 1], [], []>} : vector<256x32xbf16>, vector<32x128xbf16>, vector<256x128xf32> -> vector<256x128xf32>
    %c0_10 = arith.constant 0 : index
    %c0_11 = arith.constant 0 : index
    %14 = vector.load %arg5[%c0_10, %c0_11] : memref<1x128xf32, #tpu.memory_space<vmem>>, vector<1x128xf32>
    %15 = vector.broadcast %14 : vector<1x128xf32> to vector<256x128xf32>
    %16 = arith.addf %13, %15 : vector<256x128xf32>
    %cst_12 = arith.constant 0.000000e+00 : f32
    %17 = vector.broadcast %cst_12 : f32 to vector<256x128xf32>
    %18 = arith.cmpf oge, %16, %17 : vector<256x128xf32>
    %cst_13 = arith.constant 0.00999999977 : f32
    %19 = vector.broadcast %cst_13 : f32 to vector<256x128xf32>
    %20 = arith.mulf %19, %16 : vector<256x128xf32>
    %21 = arith.select %18, %16, %20 : vector<256x128xi1>, vector<256x128xf32>
    %cst_14 = arith.constant dense<0xFF800000> : vector<256xf32>
    %22 = vector.multi_reduction <maximumf>, %21, %cst_14 [1] : vector<256x128xf32> to vector<256xf32>
    %23 = vector.shape_cast %22 : vector<256xf32> to vector<256x1xf32>
    %24 = vector.broadcast %23 : vector<256x1xf32> to vector<256x128xf32>
    %25 = arith.subf %21, %24 : vector<256x128xf32>
    %26 = math.exp %25 : vector<256x128xf32>
    %cst_15 = arith.constant dense<0.000000e+00> : vector<256xf32>
    %27 = vector.multi_reduction <add>, %26, %cst_15 [1] : vector<256x128xf32> to vector<256xf32>
    %28 = vector.shape_cast %27 : vector<256xf32> to vector<256x1xf32>
    %29 = math.log %28 : vector<256x1xf32>
    %30 = arith.addf %29, %23 : vector<256x1xf32>
    %31 = vector.extract_strided_slice %21 {offsets = [0, 0], sizes = [256, 2], strides = [1, 1]} : vector<256x128xf32> to vector<256x2xf32>
    %32 = vector.broadcast %30 : vector<256x1xf32> to vector<256x2xf32>
    %33 = arith.subf %31, %32 : vector<256x2xf32>
    %c0_16 = arith.constant 0 : index
    %c0_17 = arith.constant 0 : index
    %34 = vector.load %arg6[%c0_16, %c0_17] : memref<256x2xf32, #tpu.memory_space<vmem>>, vector<256x2xf32>
    tpu.vector_store %arg6[%c0_16, %c0_17], %33 {strides = array<i32>} : memref<256x2xf32, #tpu.memory_space<vmem>>, vector<256x2xf32>,
    return
  }
  func.func @transform_0(%arg0: i32) -> (i32, i32) {
    %c0_i32 = arith.constant 0 : i32
    %c0_i32_0 = arith.constant 0 : i32
    return %arg0, %c0_i32 : i32, i32
  }
  func.func @transform_1(%arg0: i32) -> (i32, i32) {
    %c0_i32 = arith.constant 0 : i32
    %c0_i32_0 = arith.constant 0 : i32
    %c0_i32_1 = arith.constant 0 : i32
    return %c0_i32, %c0_i32_0 : i32, i32
  }
  func.func @transform_2(%arg0: i32) -> (i32, i32) {
    %c0_i32 = arith.constant 0 : i32
    %c0_i32_0 = arith.constant 0 : i32
    %c0_i32_1 = arith.constant 0 : i32
    return %c0_i32, %c0_i32_0 : i32, i32
  }
  func.func @transform_3(%arg0: i32) -> (i32, i32) {
    %c0_i32 = arith.constant 0 : i32
    %c0_i32_0 = arith.constant 0 : i32
    %c0_i32_1 = arith.constant 0 : i32
    return %c0_i32, %c0_i32_0 : i32, i32
  }
  func.func @transform_4(%arg0: i32) -> (i32, i32) {
    %c0_i32 = arith.constant 0 : i32
    %c0_i32_0 = arith.constant 0 : i32
    %c0_i32_1 = arith.constant 0 : i32
    return %c0_i32, %c0_i32_0 : i32, i32
  }
  func.func @transform_5(%arg0: i32) -> (i32, i32) {
    %c0_i32 = arith.constant 0 : i32
    %c0_i32_0 = arith.constant 0 : i32
    return %arg0, %c0_i32 : i32, i32
  }
}

</mosaic_0001>

<bundles_post_ra>
// kernel: tpu_custom_call.1
= control target key start
LH: loop header
LB: loop body
LE: loop exit
PB: predicated region body
PF: predicated region fallthrough
CT: control target
= control target key end

     0   :  { %vm156_vm0 = vcmask 261120   ;;  %s2117_s1 = inlined_call_operand.vmem [shape: bf16[32,32], index: 1, kind: input, shape index: {}]   ;;  %s2118_s0 = inlined_call_operand.vmem [shape: bf16[256,32], index: 0, kind: input, shape index: {}]   ;;  %s2119_s3 = inlined_call_operand.vmem [shape: bf16[32,128], index: 3, kind: input, shape index: {}]   ;;  %s2120_s2 = inlined_call_operand.vmem [shape: f32[1,32], index: 2, kind: input, shape index: {}]   ;;  %s2121_s4 = inlined_call_operand.vmem [shape: f32[1,128], index: 4, kind: input, shape index: {}]   ;;  %s2122_s5 = inlined_call_operand.vmem [shape: f32[256,2], index: 5, kind: output, shape index: {}]  }
   0x1   :  { %v1357_v0 = vld [vmem:[%s2117_s1] sm:$0xff]   ;;  %v1358_v1 = vld [vmem:[%s2117_s1 + $0x8] sm:$0xff]   ;;  %v1361_v4 = vld [vmem:[%s2118_s0 + $0x10] sm:$0xff]  }
   0x2   :  { %1285 = vmatprep.subr.bf16.mxu0 %v1357_v0  ;;  %v1359_v2 = vld [vmem:[%s2118_s0] sm:$0xff]   ;;  %v1360_v3 = vld [vmem:[%s2118_s0 + $0x8] sm:$0xff]   ;;  %v1362_v5 = vld [vmem:[%s2118_s0 + $0x18] sm:$0xff]  }
   0x3   :  { %1286 = vmatpush3.bf16.msra.mxu0 %v1357_v0  ;;  %1289 = vmatprep.mubr.msk.bf16.mxu0 %vm156_vm0, %v1359_v2  ;;  %v1363_v6 = vld [vmem:[%s2118_s0 + $0x20] sm:$0xff]   ;;  %v1364_v7 = vld [vmem:[%s2118_s0 + $0x28] sm:$0xff]   ;;  %v1365_v8 = vld [vmem:[%s2118_s0 + $0x30] sm:$0xff]  }
   0x4   :  { %1287 = vmatprep.subr.bf16.mxu0 %v1358_v1  ;;  %v1366_v9 = vld [vmem:[%s2118_s0 + $0x38] sm:$0xff]   ;;  %v1367_v10 = vld [vmem:[%s2118_s0 + $0x40] sm:$0xff]   ;;  %v1368_v11 = vld [vmem:[%s2118_s0 + $0x48] sm:$0xff]  }
   0x5   :  { %v1369_v12 = vld [vmem:[%s2118_s0 + $0x50] sm:$0xff]   ;;  %v1370_v13 = vld [vmem:[%s2118_s0 + $0x58] sm:$0xff]   ;;  %v1371_v14 = vld [vmem:[%s2118_s0 + $0x60] sm:$0xff]  }
   0x6   :  { %v1372_v15 = vld [vmem:[%s2118_s0 + $0x68] sm:$0xff]   ;;  %v1373_v16 = vld [vmem:[%s2118_s0 + $0x70] sm:$0xff]   ;;  %v1374_v17 = vld [vmem:[%s2118_s0 + $0x78] sm:$0xff]  }
   0x7   :  { %1288 = vmatpush3.bf16.msra.mxu0 %v1358_v1  ;;  %v1375_v18 = vld [vmem:[%s2119_s3] sm:$0xff]   ;;  %v1376_v19 = vld [vmem:[%s2119_s3 + $0x8] sm:$0xff]  }
   0x8   :  { %1321 = vmatprep.subr.bf16.mxu1 %v1375_v18  ;;  %v1614_v20 = vld [vmem:[%s2120_s2] ss:$0 sm:$0xff] }
   0x9   :  { %1322 = vmatpush3.bf16.msra.mxu1 %v1375_v18 }
   0xa   :  { %1290 = vmatmul.mubr.msk.bf16.vlgmr.msra.gmra.mrb[0].mxu0 %vm156_vm0, %v1360_v3  ;;  %1323 = vmatprep.subr.bf16.mxu1 %v1376_v19 }
   0xb   :  { %1293 = vmatprep.mubr.msk.bf16.mxu0 %vm156_vm0, %v1361_v4 }
   0xd   :  { %1324 = vmatpush3.bf16.msra.mxu1 %v1376_v19 }
  0x12   :  { %1294 = vmatmul.mubr.msk.bf16.gmra.mrb[4].mxu0 %vm156_vm0, %v1362_v5 }
  0x13   :  { %1297 = vmatprep.mubr.msk.bf16.mxu0 %vm156_vm0, %v1363_v6 }
  0x1a   :  { %1298 = vmatmul.mubr.msk.bf16.gmra.mrb[8].mxu0 %vm156_vm0, %v1364_v7 }
  0x1b   :  { %1301 = vmatprep.mubr.msk.bf16.mxu0 %vm156_vm0, %v1365_v8 }
  0x22   :  { %1302 = vmatmul.mubr.msk.bf16.gmra.mrb[12].mxu0 %vm156_vm0, %v1366_v9 }
  0x23   :  { %1305 = vmatprep.mubr.msk.bf16.mxu0 %vm156_vm0, %v1367_v10 }
  0x2a   :  { %1306 = vmatmul.mubr.msk.bf16.gmra.mrb[16].mxu0 %vm156_vm0, %v1368_v11 }
  0x2b   :  { %1309 = vmatprep.mubr.msk.bf16.mxu0 %vm156_vm0, %v1369_v12 }
  0x32   :  { %1310 = vmatmul.mubr.msk.bf16.gmra.mrb[20].mxu0 %vm156_vm0, %v1370_v13 }
  0x33   :  { %1313 = vmatprep.mubr.msk.bf16.mxu0 %vm156_vm0, %v1371_v14 }
  0x3a   :  { %1314 = vmatmul.mubr.msk.bf16.gmra.mrb[24].mxu0 %vm156_vm0, %v1372_v15 }
  0x3b   :  { %1317 = vmatprep.mubr.msk.bf16.mxu0 %vm156_vm0, %v1373_v16 }
  0x42   :  { %1318 = vmatmul.mubr.msk.bf16.gmra.mrb[28].mxu0 %vm156_vm0, %v1374_v17 }
  0xdd   :  { %v1291_v21 = vpop.f32.mrb[0].mxu0 }
  0xde   :  { %v248_v22 = vadd.f32 %v1291_v21, %v1614_v20  ;;  %v239_v23 = vpop.f32.mrb[1].mxu0 }
  0xdf   :  { %v240_v24 = vadd.f32 %v1614_v20, %v239_v23  ;;  %v1292_v25 = vpop.f32.mrb[2].mxu0 }
  0xe0   :  { %v400_v26 = vmul.f32 0.01, %v248_v22  ;;  %v251_v27 = vadd.f32 %v1292_v25, %v1614_v20  ;;  %v242_v28 = vpop.f32.mrb[3].mxu0  ;;  %vm368_vm1 = vcmp.ge.f32.partialorder %v248_v22, 0.0 }
  0xe1   :  { %v398_v29 = vmul.f32 0.01, %v240_v24  ;;  %v243_v30 = vadd.f32 %v1614_v20, %v242_v28  ;;  %vm366_vm3 = vcmp.ge.f32.partialorder %v240_v24, 0.0 }
  0xe2   :  { %vm369_vm2 = vcmp.ge.f32.partialorder %v251_v27, 0.0  ;;  %v401_v31 = vmul.f32 0.01, %v251_v27  ;;  %v432_v33 = vsel %vm368_vm1, %v248_v22, %v400_v26 }
  0xe3   :  { %v399_v32 = vmul.f32 0.01, %v243_v30  ;;  %vm367_vm4 = vcmp.ge.f32.partialorder %v243_v30, 0.0  ;;  %v430_v37 = vsel %vm366_vm3, %v240_v24, %v398_v29 }
  0xe4   :  { %v433_v34 = vsel %vm369_vm2, %v251_v27, %v401_v31 }
  0xe5   :  { %v463_v35 = vpack.c.bf16 %v433_v34, %v432_v33  ;;  %v1295_v36 = vpop.f32.mrb[4].mxu0  ;;  %v431_v38 = vsel %vm367_vm4, %v243_v30, %v399_v32 }
  0xe6   :  { %v264_v39 = vadd.f32 %v1295_v36, %v1614_v20  ;;  %v255_v40 = vpop.f32.mrb[5].mxu0  ;;  %v462_v41 = vpack.c.bf16 %v431_v38, %v430_v37 }
  0xe7   :  { %v256_v42 = vadd.f32 %v1614_v20, %v255_v40  ;;  %v1296_v43 = vpop.f32.mrb[6].mxu0 }
  0xe8   :  { %v404_v44 = vmul.f32 0.01, %v264_v39  ;;  %v267_v45 = vadd.f32 %v1296_v43, %v1614_v20  ;;  %v258_v46 = vpop.f32.mrb[7].mxu0  ;;  %1325 = vmatprep.mubr.msk.bf16.mxu1 %vm156_vm0, %v462_v41  ;;  %vm372_vm5 = vcmp.ge.f32.partialorder %v264_v39, 0.0 }
  0xe9   :  { %v402_v47 = vmul.f32 0.01, %v256_v42  ;;  %v259_v48 = vadd.f32 %v1614_v20, %v258_v46  ;;  %1326 = vmatmul.mubr.msk.bf16.vlgmr.msra.gmra.mrb[0].mxu1 %vm156_vm0, %v463_v35  ;;  %vm370_vm6 = vcmp.ge.f32.partialorder %v256_v42, 0.0 }
  0xea   :  { %vm373_vm7 = vcmp.ge.f32.partialorder %v267_v45, 0.0  ;;  %v405_v49 = vmul.f32 0.01, %v267_v45  ;;  %v436_v51 = vsel %vm372_vm5, %v264_v39, %v404_v44 }
  0xeb   :  { %vm371_vm8 = vcmp.ge.f32.partialorder %v259_v48, 0.0  ;;  %v403_v50 = vmul.f32 0.01, %v259_v48  ;;  %v434_v53 = vsel %vm370_vm6, %v256_v42, %v402_v47 }
  0xec   :  { %v437_v52 = vsel %vm373_vm7, %v267_v45, %v405_v49 }
  0xed   :  { %v465_v54 = vpack.c.bf16 %v437_v52, %v436_v51  ;;  %v435_v55 = vsel %vm371_vm8, %v259_v48, %v403_v50  ;;  %v1299_v56 = vpop.f32.mrb[8].mxu0 }
  0xee   :  { %v464_v57 = vpack.c.bf16 %v435_v55, %v434_v53  ;;  %v280_v58 = vadd.f32 %v1299_v56, %v1614_v20  ;;  %v271_v59 = vpop.f32.mrb[9].mxu0 }
  0xef   :  { %v272_v60 = vadd.f32 %v1614_v20, %v271_v59  ;;  %v1300_v61 = vpop.f32.mrb[10].mxu0 }
  0xf0   :  { %v408_v62 = vmul.f32 0.01, %v280_v58  ;;  %v283_v63 = vadd.f32 %v1300_v61, %v1614_v20  ;;  %v274_v0 = vpop.f32.mrb[11].mxu0  ;;  %1329 = vmatprep.mubr.msk.bf16.mxu1 %vm156_vm0, %v464_v57  ;;  %vm376_vm9 = vcmp.ge.f32.partialorder %v280_v58, 0.0 }
  0xf1   :  { %v406_v1 = vmul.f32 0.01, %v272_v60  ;;  %v275_v2 = vadd.f32 %v1614_v20, %v274_v0  ;;  %1330 = vmatmul.mubr.msk.bf16.gmra.mrb[4].mxu1 %vm156_vm0, %v465_v54  ;;  %vm374_vm10 = vcmp.ge.f32.partialorder %v272_v60, 0.0 }
  0xf2   :  { %vm377_vm11 = vcmp.ge.f32.partialorder %v283_v63, 0.0  ;;  %v409_v3 = vmul.f32 0.01, %v283_v63  ;;  %v440_v5 = vsel %vm376_vm9, %v280_v58, %v408_v62 }
  0xf3   :  { %vm375_vm12 = vcmp.ge.f32.partialorder %v275_v2, 0.0  ;;  %v407_v4 = vmul.f32 0.01, %v275_v2  ;;  %v438_v7 = vsel %vm374_vm10, %v272_v60, %v406_v1 }
  0xf4   :  { %v441_v6 = vsel %vm377_vm11, %v283_v63, %v409_v3 }
  0xf5   :  { %v467_v8 = vpack.c.bf16 %v441_v6, %v440_v5  ;;  %v439_v9 = vsel %vm375_vm12, %v275_v2, %v407_v4  ;;  %v1303_v10 = vpop.f32.mrb[12].mxu0 }
  0xf6   :  { %v466_v11 = vpack.c.bf16 %v439_v9, %v438_v7  ;;  %v296_v12 = vadd.f32 %v1303_v10, %v1614_v20  ;;  %v287_v13 = vpop.f32.mrb[13].mxu0 }
  0xf7   :  { %v288_v14 = vadd.f32 %v1614_v20, %v287_v13  ;;  %v1304_v15 = vpop.f32.mrb[14].mxu0 }
  0xf8   :  { %v412_v16 = vmul.f32 0.01, %v296_v12  ;;  %v299_v17 = vadd.f32 %v1304_v15, %v1614_v20  ;;  %v290_v18 = vpop.f32.mrb[15].mxu0  ;;  %1333 = vmatprep.mubr.msk.bf16.mxu1 %vm156_vm0, %v466_v11  ;;  %vm380_vm13 = vcmp.ge.f32.partialorder %v296_v12, 0.0 }
  0xf9   :  { %v410_v19 = vmul.f32 0.01, %v288_v14  ;;  %v291_v21 = vadd.f32 %v1614_v20, %v290_v18  ;;  %1334 = vmatmul.mubr.msk.bf16.gmra.mrb[8].mxu1 %vm156_vm0, %v467_v8  ;;  %vm378_vm14 = vcmp.ge.f32.partialorder %v288_v14, 0.0 }
  0xfa   :  { %vm381_vm15 = vcmp.ge.f32.partialorder %v299_v17, 0.0  ;;  %v413_v22 = vmul.f32 0.01, %v299_v17  ;;  %v444_v24 = vsel %vm380_vm13, %v296_v12, %v412_v16 }
  0xfb   :  { %vm379_vm1 = vcmp.ge.f32.partialorder %v291_v21, 0.0  ;;  %v411_v23 = vmul.f32 0.01, %v291_v21  ;;  %v442_v26 = vsel %vm378_vm14, %v288_v14, %v410_v19 }
  0xfc   :  { %v445_v25 = vsel %vm381_vm15, %v299_v17, %v413_v22 }
  0xfd   :  { %v469_v27 = vpack.c.bf16 %v445_v25, %v444_v24  ;;  %v443_v28 = vsel %vm379_vm1, %v291_v21, %v411_v23  ;;  %v1307_v29 = vpop.f32.mrb[16].mxu0 }
  0xfe   :  { %v468_v30 = vpack.c.bf16 %v443_v28, %v442_v26  ;;  %v312_v31 = vadd.f32 %v1307_v29, %v1614_v20  ;;  %v303_v32 = vpop.f32.mrb[17].mxu0 }
  0xff   :  { %v304_v33 = vadd.f32 %v1614_v20, %v303_v32  ;;  %v1308_v34 = vpop.f32.mrb[18].mxu0 }
 0x100   :  { %v416_v35 = vmul.f32 0.01, %v312_v31  ;;  %v315_v36 = vadd.f32 %v1308_v34, %v1614_v20  ;;  %v306_v37 = vpop.f32.mrb[19].mxu0  ;;  %1337 = vmatprep.mubr.msk.bf16.mxu1 %vm156_vm0, %v468_v30  ;;  %vm384_vm2 = vcmp.ge.f32.partialorder %v312_v31, 0.0 }
 0x101   :  { %v414_v38 = vmul.f32 0.01, %v304_v33  ;;  %v307_v39 = vadd.f32 %v1614_v20, %v306_v37  ;;  %1338 = vmatmul.mubr.msk.bf16.gmra.mrb[12].mxu1 %vm156_vm0, %v469_v27  ;;  %vm382_vm3 = vcmp.ge.f32.partialorder %v304_v33, 0.0 }
 0x102   :  { %vm385_vm4 = vcmp.ge.f32.partialorder %v315_v36, 0.0  ;;  %v417_v40 = vmul.f32 0.01, %v315_v36  ;;  %v448_v42 = vsel %vm384_vm2, %v312_v31, %v416_v35 }
 0x103   :  { %vm383_vm5 = vcmp.ge.f32.partialorder %v307_v39, 0.0  ;;  %v415_v41 = vmul.f32 0.01, %v307_v39  ;;  %v446_v44 = vsel %vm382_vm3, %v304_v33, %v414_v38 }
 0x104   :  { %v449_v43 = vsel %vm385_vm4, %v315_v36, %v417_v40 }
 0x105   :  { %v471_v45 = vpack.c.bf16 %v449_v43, %v448_v42  ;;  %v447_v46 = vsel %vm383_vm5, %v307_v39, %v415_v41  ;;  %v1311_v47 = vpop.f32.mrb[20].mxu0 }
 0x106   :  { %v470_v48 = vpack.c.bf16 %v447_v46, %v446_v44  ;;  %v328_v49 = vadd.f32 %v1311_v47, %v1614_v20  ;;  %v319_v50 = vpop.f32.mrb[21].mxu0 }
 0x107   :  { %v320_v51 = vadd.f32 %v1614_v20, %v319_v50  ;;  %v1312_v52 = vpop.f32.mrb[22].mxu0 }
 0x108   :  { %v420_v53 = vmul.f32 0.01, %v328_v49  ;;  %v331_v54 = vadd.f32 %v1312_v52, %v1614_v20  ;;  %v322_v55 = vpop.f32.mrb[23].mxu0  ;;  %1341 = vmatprep.mubr.msk.bf16.mxu1 %vm156_vm0, %v470_v48  ;;  %vm388_vm6 = vcmp.ge.f32.partialorder %v328_v49, 0.0 }
 0x109   :  { %v418_v56 = vmul.f32 0.01, %v320_v51  ;;  %v323_v57 = vadd.f32 %v1614_v20, %v322_v55  ;;  %1342 = vmatmul.mubr.msk.bf16.gmra.mrb[16].mxu1 %vm156_vm0, %v471_v45  ;;  %vm386_vm7 = vcmp.ge.f32.partialorder %v320_v51, 0.0 }
 0x10a   :  { %vm389_vm8 = vcmp.ge.f32.partialorder %v331_v54, 0.0  ;;  %v421_v58 = vmul.f32 0.01, %v331_v54  ;;  %v452_v60 = vsel %vm388_vm6, %v328_v49, %v420_v53 }
 0x10b   :  { %vm387_vm9 = vcmp.ge.f32.partialorder %v323_v57, 0.0  ;;  %v419_v59 = vmul.f32 0.01, %v323_v57  ;;  %v450_v62 = vsel %vm386_vm7, %v320_v51, %v418_v56 }
 0x10c   :  { %v453_v61 = vsel %vm389_vm8, %v331_v54, %v421_v58 }
 0x10d   :  { %v473_v63 = vpack.c.bf16 %v453_v61, %v452_v60  ;;  %v451_v0 = vsel %vm387_vm9, %v323_v57, %v419_v59  ;;  %v1315_v1 = vpop.f32.mrb[24].mxu0 }
 0x10e   :  { %v472_v2 = vpack.c.bf16 %v451_v0, %v450_v62  ;;  %v344_v3 = vadd.f32 %v1315_v1, %v1614_v20  ;;  %v335_v4 = vpop.f32.mrb[25].mxu0 }
 0x10f   :  { %v336_v5 = vadd.f32 %v1614_v20, %v335_v4  ;;  %v1316_v6 = vpop.f32.mrb[26].mxu0 }
 0x110   :  { %v424_v7 = vmul.f32 0.01, %v344_v3  ;;  %v347_v8 = vadd.f32 %v1316_v6, %v1614_v20  ;;  %v338_v9 = vpop.f32.mrb[27].mxu0  ;;  %1345 = vmatprep.mubr.msk.bf16.mxu1 %vm156_vm0, %v472_v2  ;;  %vm392_vm10 = vcmp.ge.f32.partialorder %v344_v3, 0.0 }
 0x111   :  { %v422_v10 = vmul.f32 0.01, %v336_v5  ;;  %v339_v11 = vadd.f32 %v1614_v20, %v338_v9  ;;  %1346 = vmatmul.mubr.msk.bf16.gmra.mrb[20].mxu1 %vm156_vm0, %v473_v63  ;;  %vm390_vm11 = vcmp.ge.f32.partialorder %v336_v5, 0.0 }
 0x112   :  { %vm393_vm12 = vcmp.ge.f32.partialorder %v347_v8, 0.0  ;;  %v425_v12 = vmul.f32 0.01, %v347_v8  ;;  %v456_v14 = vsel %vm392_vm10, %v344_v3, %v424_v7 }
 0x113   :  { %vm391_vm13 = vcmp.ge.f32.partialorder %v339_v11, 0.0  ;;  %v423_v13 = vmul.f32 0.01, %v339_v11  ;;  %v454_v16 = vsel %vm390_vm11, %v336_v5, %v422_v10 }
 0x114   :  { %v457_v15 = vsel %vm393_vm12, %v347_v8, %v425_v12 }
 0x115   :  { %v475_v17 = vpack.c.bf16 %v457_v15, %v456_v14  ;;  %v455_v18 = vsel %vm391_vm13, %v339_v11, %v423_v13  ;;  %v1319_v19 = vpop.f32.mrb[28].mxu0 }
 0x116   :  { %v474_v21 = vpack.c.bf16 %v455_v18, %v454_v16  ;;  %v360_v22 = vadd.f32 %v1319_v19, %v1614_v20  ;;  %v351_v23 = vpop.f32.mrb[29].mxu0 }
 0x117   :  { %v352_v24 = vadd.f32 %v1614_v20, %v351_v23  ;;  %v1320_v25 = vpop.f32.mrb[30].mxu0 }
 0x118   :  { %v428_v26 = vmul.f32 0.01, %v360_v22  ;;  %v363_v27 = vadd.f32 %v1320_v25, %v1614_v20  ;;  %v354_v28 = vpop.f32.mrb[31].mxu0  ;;  %1349 = vmatprep.mubr.msk.bf16.mxu1 %vm156_vm0, %v474_v21  ;;  %vm396_vm14 = vcmp.ge.f32.partialorder %v360_v22, 0.0 }
 0x119   :  { %v426_v29 = vmul.f32 0.01, %v352_v24  ;;  %v355_v30 = vadd.f32 %v1614_v20, %v354_v28  ;;  %1350 = vmatmul.mubr.msk.bf16.gmra.mrb[24].mxu1 %vm156_vm0, %v475_v17  ;;  %vm394_vm15 = vcmp.ge.f32.partialorder %v352_v24, 0.0  ;;  %v1667_v20 = vld [vmem:[%s2121_s4] ss:$0 sm:$0xff] }
 0x11a   :  { %vm397_vm1 = vcmp.ge.f32.partialorder %v363_v27, 0.0  ;;  %v429_v31 = vmul.f32 0.01, %v363_v27  ;;  %v460_v33 = vsel %vm396_vm14, %v360_v22, %v428_v26 }
 0x11b   :  { %vm395_vm2 = vcmp.ge.f32.partialorder %v355_v30, 0.0  ;;  %v427_v32 = vmul.f32 0.01, %v355_v30  ;;  %v458_v35 = vsel %vm394_vm15, %v352_v24, %v426_v29 }
 0x11c   :  { %v461_v34 = vsel %vm397_vm1, %v363_v27, %v429_v31 }
 0x11d   :  { %v477_v36 = vpack.c.bf16 %v461_v34, %v460_v33  ;;  %v459_v37 = vsel %vm395_vm2, %v355_v30, %v427_v32 }
 0x11e   :  { %v476_v38 = vpack.c.bf16 %v459_v37, %v458_v35 }
 0x120   :  { %1353 = vmatprep.mubr.msk.bf16.mxu1 %vm156_vm0, %v476_v38 }
 0x121   :  { %1354 = vmatmul.mubr.msk.bf16.gmra.mrb[28].mxu1 %vm156_vm0, %v477_v36 }
 0x1bc   :  { %v1327_v39 = vpop.f32.mrb[0].mxu1 }
 0x1bd   :  { %v592_v40 = vadd.f32 %v1327_v39, %v1667_v20  ;;  %v583_v41 = vpop.f32.mrb[1].mxu1 }
 0x1be   :  { %v584_v42 = vadd.f32 %v1667_v20, %v583_v41  ;;  %v1328_v43 = vpop.f32.mrb[2].mxu1 }
 0x1bf   :  { %v744_v44 = vmul.f32 0.01, %v592_v40  ;;  %v595_v45 = vadd.f32 %v1328_v43, %v1667_v20  ;;  %v586_v46 = vpop.f32.mrb[3].mxu1  ;;  %vm712_vm3 = vcmp.ge.f32.partialorder %v592_v40, 0.0 }
 0x1c0   :  { %v742_v47 = vmul.f32 0.01, %v584_v42  ;;  %v587_v48 = vadd.f32 %v1667_v20, %v586_v46  ;;  %vm710_vm0 = vcmp.ge.f32.partialorder %v584_v42, 0.0 }
 0x1c1   :  { %v745_v49 = vmul.f32 0.01, %v595_v45  ;;  %v1673_v50 = vsel %vm712_vm3, %v592_v40, %v744_v44  ;;  %vm713_vm4 = vcmp.ge.f32.partialorder %v595_v45, 0.0 }
 0x1c2   :  { %v743_v51 = vmul.f32 0.01, %v587_v48  ;;  %810 = vmax.xlane.f32.xlu1 %v1673_v50  ;;  %v1676_v52 = vsel %vm710_vm0, %v584_v42, %v742_v47  ;;  %vm711_vm5 = vcmp.ge.f32.partialorder %v587_v48, 0.0 }
 0x1c3   :  { %806 = vmax.xlane.f32.xlu0 %v1676_v52  ;;  %v1680_v56 = vsel %vm713_vm4, %v595_v45, %v745_v49 }
 0x1c4   :  { %v1331_v53 = vpop.f32.mrb[4].mxu1  ;;  %v1684_v59 = vsel %vm711_vm5, %v587_v48, %v743_v51 }
 0x1c5   :  { %v608_v54 = vadd.f32 %v1331_v53, %v1667_v20  ;;  %v599_v55 = vpop.f32.mrb[5].mxu1 }
 0x1c6   :  { %v600_v57 = vadd.f32 %v1667_v20, %v599_v55  ;;  %812 = vmax.xlane.f32.xlu1 %v1680_v56  ;;  %v1332_v58 = vpop.f32.mrb[6].mxu1 }
 0x1c7   :  { %v748_v60 = vmul.f32 0.01, %v608_v54  ;;  %v611_v61 = vadd.f32 %v1332_v58, %v1667_v20  ;;  %v602_v62 = vpop.f32.mrb[7].mxu1  ;;  %808 = vmax.xlane.f32.xlu0 %v1684_v59  ;;  %vm716_vm6 = vcmp.ge.f32.partialorder %v608_v54, 0.0 }
 0x1c8   :  { %v603_v63 = vadd.f32 %v1667_v20, %v602_v62  ;;  %v746_v2 = vmul.f32 0.01, %v600_v57  ;;  %vm714_vm8 = vcmp.ge.f32.partialorder %v600_v57, 0.0 }
 0x1c9   :  { %v749_v0 = vmul.f32 0.01, %v611_v61  ;;  %v1689_v1 = vsel %vm716_vm6, %v608_v54, %v748_v60  ;;  %vm717_vm7 = vcmp.ge.f32.partialorder %v611_v61, 0.0 }
 0x1ca   :  { %v747_v3 = vmul.f32 0.01, %v603_v63  ;;  %vm715_vm9 = vcmp.ge.f32.partialorder %v603_v63, 0.0  ;;  %v1697_v10 = vsel %vm714_vm8, %v600_v57, %v746_v2 }
 0x1cb   :  { %818 = vmax.xlane.f32.xlu0 %v1689_v1  ;;  %v1692_v4 = vsel %vm717_vm7, %v611_v61, %v749_v0 }
 0x1cc   :  { %820 = vmax.xlane.f32.xlu1 %v1692_v4  ;;  %v1335_v5 = vpop.f32.mrb[8].mxu1  ;;  %v1701_v14 = vsel %vm715_vm9, %v603_v63, %v747_v3 }
 0x1cd   :  { %v624_v6 = vadd.f32 %v1335_v5, %v1667_v20  ;;  %v615_v7 = vpop.f32.mrb[9].mxu1 }
 0x1ce   :  { %v616_v8 = vadd.f32 %v1667_v20, %v615_v7  ;;  %v1336_v9 = vpop.f32.mrb[10].mxu1 }
 0x1cf   :  { %v752_v11 = vmul.f32 0.01, %v624_v6  ;;  %v627_v12 = vadd.f32 %v1336_v9, %v1667_v20  ;;  %v618_v13 = vpop.f32.mrb[11].mxu1  ;;  %814 = vmax.xlane.f32.xlu0 %v1697_v10  ;;  %vm720_vm10 = vcmp.ge.f32.partialorder %v624_v6, 0.0 }
 0x1d0   :  { %v619_v15 = vadd.f32 %v1667_v20, %v618_v13  ;;  %816 = vmax.xlane.f32.xlu1 %v1701_v14  ;;  %v750_v18 = vmul.f32 0.01, %v616_v8  ;;  %vm718_vm12 = vcmp.ge.f32.partialorder %v616_v8, 0.0 }
 0x1d1   :  { %v753_v16 = vmul.f32 0.01, %v627_v12  ;;  %v1705_v17 = vsel %vm720_vm10, %v624_v6, %v752_v11  ;;  %vm721_vm11 = vcmp.ge.f32.partialorder %v627_v12, 0.0 }
 0x1d2   :  { %v751_v19 = vmul.f32 0.01, %v619_v15  ;;  %vm719_vm13 = vcmp.ge.f32.partialorder %v619_v15, 0.0  ;;  %v1713_v27 = vsel %vm718_vm12, %v616_v8, %v750_v18 }
 0x1d3   :  { %826 = vmax.xlane.f32.xlu0 %v1705_v17  ;;  %v1708_v21 = vsel %vm721_vm11, %v627_v12, %v753_v16 }
 0x1d4   :  { %v1339_v22 = vpop.f32.mrb[12].mxu1  ;;  %828 = vmax.xlane.f32.xlu1 %v1708_v21  ;;  %v1717_v31 = vsel %vm719_vm13, %v619_v15, %v751_v19 }
 0x1d5   :  { %v640_v23 = vadd.f32 %v1339_v22, %v1667_v20  ;;  %v631_v24 = vpop.f32.mrb[13].mxu1 }
 0x1d6   :  { %v632_v25 = vadd.f32 %v1667_v20, %v631_v24  ;;  %v1340_v26 = vpop.f32.mrb[14].mxu1 }
 0x1d7   :  { %v756_v28 = vmul.f32 0.01, %v640_v23  ;;  %v643_v29 = vadd.f32 %v1340_v26, %v1667_v20  ;;  %v634_v30 = vpop.f32.mrb[15].mxu1  ;;  %822 = vmax.xlane.f32.xlu0 %v1713_v27  ;;  %vm724_vm14 = vcmp.ge.f32.partialorder %v640_v23, 0.0 }
 0x1d8   :  { %v635_v32 = vadd.f32 %v1667_v20, %v634_v30  ;;  %824 = vmax.xlane.f32.xlu1 %v1717_v31  ;;  %v754_v35 = vmul.f32 0.01, %v632_v25  ;;  %vm722_vm1 = vcmp.ge.f32.partialorder %v632_v25, 0.0 }
 0x1d9   :  { %v757_v33 = vmul.f32 0.01, %v643_v29  ;;  %v1721_v34 = vsel %vm724_vm14, %v640_v23, %v756_v28  ;;  %vm725_vm15 = vcmp.ge.f32.partialorder %v643_v29, 0.0 }
 0x1da   :  { %v755_v36 = vmul.f32 0.01, %v635_v32  ;;  %vm723_vm2 = vcmp.ge.f32.partialorder %v635_v32, 0.0  ;;  %v1729_v43 = vsel %vm722_vm1, %v632_v25, %v754_v35 }
 0x1db   :  { %834 = vmax.xlane.f32.xlu0 %v1721_v34  ;;  %v1724_v37 = vsel %vm725_vm15, %v643_v29, %v757_v33 }
 0x1dc   :  { %v1343_v38 = vpop.f32.mrb[16].mxu1  ;;  %836 = vmax.xlane.f32.xlu1 %v1724_v37  ;;  %v1733_v47 = vsel %vm723_vm2, %v635_v32, %v755_v36 }
 0x1dd   :  { %v656_v39 = vadd.f32 %v1343_v38, %v1667_v20  ;;  %v647_v40 = vpop.f32.mrb[17].mxu1 }
 0x1de   :  { %v648_v41 = vadd.f32 %v1667_v20, %v647_v40  ;;  %v1344_v42 = vpop.f32.mrb[18].mxu1 }
 0x1df   :  { %v760_v44 = vmul.f32 0.01, %v656_v39  ;;  %v659_v45 = vadd.f32 %v1344_v42, %v1667_v20  ;;  %v650_v46 = vpop.f32.mrb[19].mxu1  ;;  %830 = vmax.xlane.f32.xlu0 %v1729_v43  ;;  %vm728_vm3 = vcmp.ge.f32.partialorder %v656_v39, 0.0 }
 0x1e0   :  { %v651_v48 = vadd.f32 %v1667_v20, %v650_v46  ;;  %832 = vmax.xlane.f32.xlu1 %v1733_v47  ;;  %v758_v53 = vmul.f32 0.01, %v648_v41  ;;  %vm726_vm4 = vcmp.ge.f32.partialorder %v648_v41, 0.0 }
 0x1e1   :  { %v761_v49 = vmul.f32 0.01, %v659_v45  ;;  %v1737_v51 = vsel %vm728_vm3, %v656_v39, %v760_v44  ;;  %vm729_vm0 = vcmp.ge.f32.partialorder %v659_v45, 0.0  ;;  %vm1158_vm3 = vcmask 15360  }
 0x1e2   :  { %v759_v54 = vmul.f32 0.01, %v651_v48  ;;  %vm727_vm5 = vcmp.ge.f32.partialorder %v651_v48, 0.0  ;;  %v1745_v63 = vsel %vm726_vm4, %v648_v41, %v758_v53 }
 0x1e3   :  { %842 = vmax.xlane.f32.xlu0 %v1737_v51  ;;  %v1740_v55 = vsel %vm729_vm0, %v659_v45, %v761_v49  ;;  %2136 = vst [vmem:[#allocation2_spill] sm:$0xff] %v1745_v63 }
 0x1e4   :  { %v1347_v57 = vpop.f32.mrb[20].mxu1  ;;  %844 = vmax.xlane.f32.xlu1 %v1740_v55  ;;  %v1749_v5 = vsel %vm727_vm5, %v651_v48, %v759_v54 }
 0x1e5   :  { %v672_v58 = vadd.f32 %v1347_v57, %v1667_v20  ;;  %v663_v60 = vpop.f32.mrb[21].mxu1  ;;  %2137 = vst [vmem:[#allocation3_spill] sm:$0xff] %v1749_v5 }
 0x1e6   :  { %v664_v61 = vadd.f32 %v1667_v20, %v663_v60  ;;  %v1348_v62 = vpop.f32.mrb[22].mxu1 }
 0x1e7   :  { %v764_v0 = vmul.f32 0.01, %v672_v58  ;;  %v675_v2 = vadd.f32 %v1348_v62, %v1667_v20  ;;  %v666_v3 = vpop.f32.mrb[23].mxu1  ;;  %838 = vmax.xlane.f32.xlu0 %v1745_v63  ;;  %vm732_vm6 = vcmp.ge.f32.partialorder %v672_v58, 0.0 }
 0x1e8   :  { %v667_v6 = vadd.f32 %v1667_v20, %v666_v3  ;;  %840 = vmax.xlane.f32.xlu1 %v1749_v5  ;;  %v762_v9 = vmul.f32 0.01, %v664_v61  ;;  %vm730_vm8 = vcmp.ge.f32.partialorder %v664_v61, 0.0 }
 0x1e9   :  { %v765_v7 = vmul.f32 0.01, %v675_v2  ;;  %v1753_v8 = vsel %vm732_vm6, %v672_v58, %v764_v0  ;;  %vm733_vm7 = vcmp.ge.f32.partialorder %v675_v2, 0.0 }
 0x1ea   :  { %2138 = vst [vmem:[#allocation4_spill] sm:$0xff] %v1753_v8  ;;  %v763_v11 = vmul.f32 0.01, %v667_v6  ;;  %vm731_vm9 = vcmp.ge.f32.partialorder %v667_v6, 0.0  ;;  %v1761_v22 = vsel %vm730_vm8, %v664_v61, %v762_v9 }
 0x1eb   :  { %850 = vmax.xlane.f32.xlu0 %v1753_v8  ;;  %v1756_v12 = vsel %vm733_vm7, %v675_v2, %v765_v7  ;;  %2140 = vst [vmem:[#allocation6_spill] sm:$0xff] %v1761_v22 }
 0x1ec   :  { %2139 = vst [vmem:[#allocation5_spill] sm:$0xff] %v1756_v12  ;;  %v1351_v13 = vpop.f32.mrb[24].mxu1  ;;  %852 = vmax.xlane.f32.xlu1 %v1756_v12  ;;  %v1765_v26 = vsel %vm731_vm9, %v667_v6, %v763_v11 }
 0x1ed   :  { %v688_v15 = vadd.f32 %v1351_v13, %v1667_v20  ;;  %v679_v16 = vpop.f32.mrb[25].mxu1  ;;  %2141 = vst [vmem:[#allocation7_spill] sm:$0xff] %v1765_v26 }
 0x1ee   :  { %v680_v18 = vadd.f32 %v1667_v20, %v679_v16  ;;  %v1352_v19 = vpop.f32.mrb[26].mxu1 }
 0x1ef   :  { %v768_v23 = vmul.f32 0.01, %v688_v15  ;;  %v691_v24 = vadd.f32 %v1352_v19, %v1667_v20  ;;  %v682_v25 = vpop.f32.mrb[27].mxu1  ;;  %846 = vmax.xlane.f32.xlu0 %v1761_v22  ;;  %vm736_vm10 = vcmp.ge.f32.partialorder %v688_v15, 0.0 }
 0x1f0   :  { %v683_v28 = vadd.f32 %v1667_v20, %v682_v25  ;;  %848 = vmax.xlane.f32.xlu1 %v1765_v26  ;;  %v766_v32 = vmul.f32 0.01, %v680_v18  ;;  %vm734_vm12 = vcmp.ge.f32.partialorder %v680_v18, 0.0 }
 0x1f1   :  { %v769_v29 = vmul.f32 0.01, %v691_v24  ;;  %v1769_v30 = vsel %vm736_vm10, %v688_v15, %v768_v23  ;;  %vm737_vm11 = vcmp.ge.f32.partialorder %v691_v24, 0.0 }
 0x1f2   :  { %2142 = vst [vmem:[#allocation8_spill] sm:$0xff] %v1769_v30  ;;  %v767_v33 = vmul.f32 0.01, %v683_v28  ;;  %vm735_vm13 = vcmp.ge.f32.partialorder %v683_v28, 0.0  ;;  %v1777_v42 = vsel %vm734_vm12, %v680_v18, %v766_v32 }
 0x1f3   :  { %858 = vmax.xlane.f32.xlu0 %v1769_v30  ;;  %v1772_v35 = vsel %vm737_vm11, %v691_v24, %v769_v29  ;;  %2144 = vst [vmem:[#allocation10_spill] sm:$0xff] %v1777_v42 }
 0x1f4   :  { %2143 = vst [vmem:[#allocation9_spill] sm:$0xff] %v1772_v35  ;;  %v1355_v36 = vpop.f32.mrb[28].mxu1  ;;  %860 = vmax.xlane.f32.xlu1 %v1772_v35  ;;  %v1780_v45 = vsel %vm735_vm13, %v683_v28, %v767_v33 }
 0x1f5   :  { %v695_v38 = vpop.f32.mrb[29].mxu1  ;;  %v704_v39 = vadd.f32 %v1355_v36, %v1667_v20  ;;  %2145 = vst [vmem:[#allocation11_spill] sm:$0xff] %v1780_v45 }
 0x1f6   :  { %v696_v40 = vadd.f32 %v1667_v20, %v695_v38  ;;  %v1356_v41 = vpop.f32.mrb[30].mxu1 }
 0x1f7   :  { %v698_v44 = vpop.f32.mrb[31].mxu1  ;;  %854 = vmax.xlane.f32.xlu0 %v1777_v42  ;;  %v707_v48 = vadd.f32 %v1356_v41, %v1667_v20  ;;  %v772_v53 = vmul.f32 0.01, %v704_v39  ;;  %vm740_vm1 = vcmp.ge.f32.partialorder %v704_v39, 0.0 }
 0x1f8   :  { %v770_v46 = vmul.f32 0.01, %v696_v40  ;;  %v699_v49 = vadd.f32 %v1667_v20, %v698_v44  ;;  %856 = vmax.xlane.f32.xlu1 %v1780_v45  ;;  %vm738_vm14 = vcmp.ge.f32.partialorder %v696_v40, 0.0 }
 0x1f9   :  { %v773_v58 = vmul.f32 0.01, %v707_v48  ;;  %vm741_vm2 = vcmp.ge.f32.partialorder %v707_v48, 0.0  ;;  %v1791_v61 = vsel %vm740_vm1, %v704_v39, %v772_v53 }
 0x1fa   :  { %v771_v54 = vmul.f32 0.01, %v699_v49  ;;  %v1785_v57 = vsel %vm738_vm14, %v696_v40, %v770_v46  ;;  %vm739_vm15 = vcmp.ge.f32.partialorder %v699_v49, 0.0  ;;  %2148 = vst [vmem:[#allocation14_spill] sm:$0xff] %v1791_v61 }
 0x1fb   :  { %2146 = vst [vmem:[#allocation12_spill] sm:$0xff] %v1785_v57  ;;  %862 = vmax.xlane.f32.xlu0 %v1785_v57  ;;  %v1794_v20 = vsel %vm741_vm2, %v707_v48, %v773_v58 }
 0x1fc   :  { %v1788_v60 = vsel %vm739_vm15, %v699_v49, %v771_v54 }
 0x1fd   :  { %2147 = vst [vmem:[#allocation13_spill] sm:$0xff] %v1788_v60  ;;  %864 = vmax.xlane.f32.xlu1 %v1788_v60 }
 0x1ff   :  { %866 = vmax.xlane.f32.xlu0 %v1791_v61 }
 0x201   :  { %868 = vmax.xlane.f32.xlu1 %v1794_v20 }
 0x24f   :  { %v1797_v62 = vpop.xlane.xlu1 %810 }
 0x250   :  { %v872_v0 = vsub.f32 %v1673_v50, %v1797_v62  ;;  %v1801_v2 = vpop.xlane.xlu0 %806 }
 0x251   :  { %v870_v3 = vsub.f32 %v1676_v52, %v1801_v2 }
 0x252   :  { %v906_v6 = vmul.f32 1.442695, %v872_v0 }
 0x253   :  { %v902_v7 = vmul.f32 1.442695, %v870_v3  ;;  %v1805_v9 = vpop.xlane.xlu1 %812 }
 0x254   :  { %1377 = vpow2.f32 %v906_v6  ;;  %v873_v11 = vsub.f32 %v1680_v56, %v1805_v9  ;;  %v1809_v13 = vpop.xlane.xlu0 %808 }
 0x255   :  { %v871_v15 = vsub.f32 %v1684_v59, %v1809_v13  ;;  %1379 = vpow2.f32 %v902_v7 }
 0x256   :  { %v908_v16 = vmul.f32 1.442695, %v873_v11 }
 0x257   :  { %v904_v18 = vmul.f32 1.442695, %v871_v15 }
 0x258   :  { %1381 = vpow2.f32 %v908_v16  ;;  %v1813_v19 = vpop.xlane.xlu0 %818 }
 0x259   :  { %v876_v23 = vsub.f32 %v1689_v1, %v1813_v19  ;;  %v1817_v24 = vpop.xlane.xlu1 %820  ;;  %1383 = vpow2.f32 %v904_v18 }
 0x25a   :  { %v877_v25 = vsub.f32 %v1692_v4, %v1817_v24 }
 0x25b   :  { %v914_v28 = vmul.f32 1.442695, %v876_v23 }
 0x25c   :  { %v916_v29 = vmul.f32 1.442695, %v877_v25  ;;  %v1821_v32 = vpop.xlane.xlu0 %814 }
 0x25d   :  { %1385 = vpow2.f32 %v914_v28  ;;  %v874_v33 = vsub.f32 %v1697_v10, %v1821_v32  ;;  %v1825_v36 = vpop.xlane.xlu1 %816 }
 0x25e   :  { %v1378_v38 = vpop.eup %1377  ;;  %v875_v39 = vsub.f32 %v1701_v14, %v1825_v36  ;;  %1387 = vpow2.f32 %v916_v29 }
 0x25f   :  { %v910_v40 = vmul.f32 1.442695, %v874_v33  ;;  %970 = vadd.xlane.f32.xlu0 %v1378_v38  ;;  %v1380_v46 = vpop.eup %1379 }
 0x260   :  { %v912_v41 = vmul.f32 1.442695, %v875_v39  ;;  %v1829_v44 = vpop.xlane.xlu0 %826 }
 0x261   :  { %1389 = vpow2.f32 %v910_v40  ;;  %v880_v48 = vsub.f32 %v1705_v17, %v1829_v44  ;;  %v1833_v49 = vpop.xlane.xlu1 %828 }
 0x262   :  { %v1382_v53 = vpop.eup %1381  ;;  %v881_v54 = vsub.f32 %v1708_v21, %v1833_v49  ;;  %1391 = vpow2.f32 %v912_v41 }
 0x263   :  { %v922_v58 = vmul.f32 1.442695, %v880_v48  ;;  %972 = vadd.xlane.f32.xlu1 %v1382_v53  ;;  %966 = vadd.xlane.f32.xlu0 %v1380_v46  ;;  %v1384_v11 = vpop.eup %1383 }
 0x264   :  { %v924_v0 = vmul.f32 1.442695, %v881_v54  ;;  %v1837_v3 = vpop.xlane.xlu0 %822 }
 0x265   :  { %1393 = vpow2.f32 %v922_v58  ;;  %v878_v6 = vsub.f32 %v1713_v27, %v1837_v3  ;;  %v1841_v7 = vpop.xlane.xlu1 %824 }
 0x266   :  { %v879_v15 = vsub.f32 %v1717_v31, %v1841_v7  ;;  %1395 = vpow2.f32 %v924_v0 }
 0x267   :  { %v1386_v16 = vpop.eup %1385  ;;  %v918_v18 = vmul.f32 1.442695, %v878_v6  ;;  %968 = vadd.xlane.f32.xlu1 %v1384_v11 }
 0x268   :  { %v920_v23 = vmul.f32 1.442695, %v879_v15  ;;  %978 = vadd.xlane.f32.xlu0 %v1386_v16  ;;  %v1845_v25 = vpop.xlane.xlu0 %834  ;;  %v1388_v33 = vpop.eup %1387 }
 0x269   :  { %1397 = vpow2.f32 %v918_v18  ;;  %v884_v28 = vsub.f32 %v1721_v34, %v1845_v25  ;;  %v1849_v29 = vpop.xlane.xlu1 %836 }
 0x26a   :  { %v885_v38 = vsub.f32 %v1724_v37, %v1849_v29  ;;  %1399 = vpow2.f32 %v920_v23 }
 0x26b   :  { %v1390_v39 = vpop.eup %1389  ;;  %v930_v40 = vmul.f32 1.442695, %v884_v28  ;;  %980 = vadd.xlane.f32.xlu1 %v1388_v33 }
 0x26c   :  { %v932_v41 = vmul.f32 1.442695, %v885_v38  ;;  %974 = vadd.xlane.f32.xlu0 %v1390_v39  ;;  %v1853_v46 = vpop.xlane.xlu0 %830  ;;  %v1392_v54 = vpop.eup %1391 }
 0x26d   :  { %1401 = vpow2.f32 %v930_v40  ;;  %v882_v48 = vsub.f32 %v1729_v43, %v1853_v46  ;;  %v1857_v53 = vpop.xlane.xlu1 %832 }
 0x26e   :  { %v883_v58 = vsub.f32 %v1733_v47, %v1857_v53  ;;  %1403 = vpow2.f32 %v932_v41 }
 0x26f   :  { %v1394_v0 = vpop.eup %1393  ;;  %v926_v6 = vmul.f32 1.442695, %v882_v48  ;;  %976 = vadd.xlane.f32.xlu1 %v1392_v54 }
 0x270   :  { %v928_v11 = vmul.f32 1.442695, %v883_v58  ;;  %986 = vadd.xlane.f32.xlu0 %v1394_v0  ;;  %v1861_v15 = vpop.xlane.xlu0 %842  ;;  %v1396_v23 = vpop.eup %1395 }
 0x271   :  { %1405 = vpow2.f32 %v926_v6  ;;  %v888_v16 = vsub.f32 %v1737_v51, %v1861_v15  ;;  %v1865_v18 = vpop.xlane.xlu1 %844 }
 0x272   :  { %v889_v28 = vsub.f32 %v1740_v55, %v1865_v18  ;;  %1407 = vpow2.f32 %v928_v11 }
 0x273   :  { %v1398_v33 = vpop.eup %1397  ;;  %v938_v38 = vmul.f32 1.442695, %v888_v16  ;;  %988 = vadd.xlane.f32.xlu1 %v1396_v23 }
 0x274   :  { %v940_v39 = vmul.f32 1.442695, %v889_v28  ;;  %982 = vadd.xlane.f32.xlu0 %v1398_v33  ;;  %v1869_v40 = vpop.xlane.xlu0 %838  ;;  %v1400_v54 = vpop.eup %1399 }
 0x275   :  { %1409 = vpow2.f32 %v938_v38  ;;  %v886_v41 = vsub.f32 %v1745_v63, %v1869_v40  ;;  %v1873_v48 = vpop.xlane.xlu1 %840 }
 0x276   :  { %v887_v58 = vsub.f32 %v1749_v5, %v1873_v48  ;;  %1411 = vpow2.f32 %v940_v39 }
 0x277   :  { %v1402_v0 = vpop.eup %1401  ;;  %v934_v6 = vmul.f32 1.442695, %v886_v41  ;;  %984 = vadd.xlane.f32.xlu1 %v1400_v54 }
 0x278   :  { %v936_v16 = vmul.f32 1.442695, %v887_v58  ;;  %994 = vadd.xlane.f32.xlu0 %v1402_v0  ;;  %v1877_v11 = vpop.xlane.xlu0 %850  ;;  %v1404_v33 = vpop.eup %1403 }
 0x279   :  { %1413 = vpow2.f32 %v934_v6  ;;  %v892_v23 = vsub.f32 %v1753_v8, %v1877_v11  ;;  %v1881_v28 = vpop.xlane.xlu1 %852 }
 0x27a   :  { %v893_v38 = vsub.f32 %v1756_v12, %v1881_v28  ;;  %1415 = vpow2.f32 %v936_v16 }
 0x27b   :  { %v1406_v63 = vpop.eup %1405  ;;  %v946_v5 = vmul.f32 1.442695, %v892_v23  ;;  %996 = vadd.xlane.f32.xlu1 %v1404_v33 }
 0x27c   :  { %v948_v41 = vmul.f32 1.442695, %v893_v38  ;;  %990 = vadd.xlane.f32.xlu0 %v1406_v63  ;;  %v1885_v39 = vpop.xlane.xlu0 %846  ;;  %v1408_v0 = vpop.eup %1407 }
 0x27d   :  { %1417 = vpow2.f32 %v946_v5  ;;  %v890_v54 = vsub.f32 %v1761_v22, %v1885_v39  ;;  %v1889_v58 = vpop.xlane.xlu1 %848 }
 0x27e   :  { %v891_v6 = vsub.f32 %v1765_v26, %v1889_v58  ;;  %1419 = vpow2.f32 %v948_v41 }
 0x27f   :  { %v1410_v8 = vpop.eup %1409  ;;  %v942_v12 = vmul.f32 1.442695, %v890_v54  ;;  %992 = vadd.xlane.f32.xlu1 %v1408_v0 }
 0x280   :  { %v944_v23 = vmul.f32 1.442695, %v891_v6  ;;  %1002 = vadd.xlane.f32.xlu0 %v1410_v8  ;;  %v1893_v16 = vpop.xlane.xlu0 %858  ;;  %v1412_v33 = vpop.eup %1411 }
 0x281   :  { %1421 = vpow2.f32 %v942_v12  ;;  %v896_v63 = vsub.f32 %v1769_v30, %v1893_v16  ;;  %v1897_v5 = vpop.xlane.xlu1 %860 }
 0x282   :  { %v897_v38 = vsub.f32 %v1772_v35, %v1897_v5  ;;  %1423 = vpow2.f32 %v944_v23 }
 0x283   :  { %v1414_v22 = vpop.eup %1413  ;;  %v954_v26 = vmul.f32 1.442695, %v896_v63  ;;  %1004 = vadd.xlane.f32.xlu1 %v1412_v33 }
 0x284   :  { %v956_v54 = vmul.f32 1.442695, %v897_v38  ;;  %998 = vadd.xlane.f32.xlu0 %v1414_v22  ;;  %v1901_v41 = vpop.xlane.xlu0 %854  ;;  %v1416_v0 = vpop.eup %1415 }
 0x285   :  { %1425 = vpow2.f32 %v954_v26  ;;  %v894_v8 = vsub.f32 %v1777_v42, %v1901_v41  ;;  %v1905_v12 = vpop.xlane.xlu1 %856 }
 0x286   :  { %v895_v6 = vsub.f32 %v1780_v45, %v1905_v12  ;;  %1427 = vpow2.f32 %v956_v54 }
 0x287   :  { %v1418_v30 = vpop.eup %1417  ;;  %v950_v35 = vmul.f32 1.442695, %v894_v8  ;;  %1000 = vadd.xlane.f32.xlu1 %v1416_v0 }
 0x288   :  { %v952_v63 = vmul.f32 1.442695, %v895_v6  ;;  %1010 = vadd.xlane.f32.xlu0 %v1418_v30  ;;  %v1909_v23 = vpop.xlane.xlu0 %862  ;;  %v1420_v26 = vpop.eup %1419 }
 0x289   :  { %1429 = vpow2.f32 %v950_v35  ;;  %v898_v22 = vsub.f32 %v1785_v57, %v1909_v23 }
 0x28a   :  { %v1913_v33 = vpop.xlane.xlu1 %864  ;;  %1431 = vpow2.f32 %v952_v63 }
 0x28b   :  { %v1422_v38 = vpop.eup %1421  ;;  %v958_v42 = vmul.f32 1.442695, %v898_v22  ;;  %v899_v45 = vsub.f32 %v1788_v60, %v1913_v33  ;;  %1012 = vadd.xlane.f32.xlu1 %v1420_v26 }
 0x28c   :  { %1006 = vadd.xlane.f32.xlu0 %v1422_v38  ;;  %v1917_v54 = vpop.xlane.xlu0 %866  ;;  %v1424_v8 = vpop.eup %1423 }
 0x28d   :  { %1433 = vpow2.f32 %v958_v42  ;;  %v960_v30 = vmul.f32 1.442695, %v899_v45  ;;  %v900_v35 = vsub.f32 %v1791_v61, %v1917_v54 }
 0x28e   :  { %v1921_v0 = vpop.xlane.xlu1 %868 }
 0x28f   :  { %v1426_v6 = vpop.eup %1425  ;;  %1435 = vpow2.f32 %v960_v30  ;;  %v962_v57 = vmul.f32 1.442695, %v900_v35  ;;  %v901_v22 = vsub.f32 %v1794_v20, %v1921_v0  ;;  %1008 = vadd.xlane.f32.xlu1 %v1424_v8 }
 0x290   :  { %1018 = vadd.xlane.f32.xlu0 %v1426_v6  ;;  %v1428_v26 = vpop.eup %1427 }
 0x291   :  { %1437 = vpow2.f32 %v962_v57  ;;  %v964_v63 = vmul.f32 1.442695, %v901_v22 }
 0x293   :  { %v1430_v38 = vpop.eup %1429  ;;  %1439 = vpow2.f32 %v964_v63  ;;  %1020 = vadd.xlane.f32.xlu1 %v1428_v26 }
 0x294   :  { %1014 = vadd.xlane.f32.xlu0 %v1430_v38  ;;  %v1432_v42 = vpop.eup %1431 }
 0x297   :  { %v1434_v45 = vpop.eup %1433  ;;  %1016 = vadd.xlane.f32.xlu1 %v1432_v42 }
 0x298   :  { %1022 = vadd.xlane.f32.xlu0 %v1434_v45 }
 0x299   :  { %v1436_v61 = vpop.eup %1435 }
 0x29b   :  { %v1438_v60 = vpop.eup %1437  ;;  %1024 = vadd.xlane.f32.xlu1 %v1436_v61 }
 0x29c   :  { %1026 = vadd.xlane.f32.xlu0 %v1438_v60 }
 0x29d   :  { %v1440_v30 = vpop.eup %1439 }
 0x29f   :  { %1028 = vadd.xlane.f32.xlu1 %v1440_v30 }
 0x2ec   :  { %v971_v35 = vpop.xlane.xlu0 %970 }
 0x2ed   :  { %1441 = vlog2.f32 %v971_v35 }
 0x2f0   :  { %v973_v8 = vpop.xlane.xlu1 %972  ;;  %v967_v57 = vpop.xlane.xlu0 %966 }
 0x2f1   :  { %1443 = vlog2.f32 %v973_v8 }
 0x2f2   :  { %1445 = vlog2.f32 %v967_v57 }
 0x2f4   :  { %v969_v6 = vpop.xlane.xlu1 %968 }
 0x2f5   :  { %1447 = vlog2.f32 %v969_v6  ;;  %v979_v22 = vpop.xlane.xlu0 %978 }
 0x2f6   :  { %1449 = vlog2.f32 %v979_v22 }
 0x2f7   :  { %v1442_v63 = vpop.eup %1441 }
 0x2f8   :  { %v1035_v26 = vmul.f32 0.6931472, %v1442_v63  ;;  %v981_v38 = vpop.xlane.xlu1 %980 }
 0x2f9   :  { %1451 = vlog2.f32 %v981_v38  ;;  %v975_v42 = vpop.xlane.xlu0 %974 }
 0x2fa   :  { %v1096_v61 = vadd.f32 %v1035_v26, %v1797_v62  ;;  %1453 = vlog2.f32 %v975_v42 }
 0x2fb   :  { %v1444_v60 = vpop.eup %1443 }
 0x2fc   :  { %v1446_v45 = vpop.eup %1445  ;;  %v1128_v30 = vsub.f32 %v1673_v50, %v1096_v61  ;;  %v1037_v35 = vmul.f32 0.6931472, %v1444_v60  ;;  %v977_v8 = vpop.xlane.xlu1 %976 }
 0x2fd   :  { %v1031_v57 = vmul.f32 0.6931472, %v1446_v45  ;;  %1455 = vlog2.f32 %v977_v8  ;;  %v987_v6 = vpop.xlane.xlu0 %986 }
 0x2fe   :  { %1161 = vst.msk [vmem:[%s2122_s5 + $0x10] sm:$0xff] %vm1158_vm3, %v1128_v30  ;;  %v1097_v22 = vadd.f32 %v1037_v35, %v1805_v9  ;;  %1457 = vlog2.f32 %v987_v6 }
 0x2ff   :  { %v1448_v62 = vpop.eup %1447  ;;  %v1094_v63 = vadd.f32 %v1031_v57, %v1801_v2 }
 0x300   :  { %v1450_v26 = vpop.eup %1449  ;;  %v1129_v38 = vsub.f32 %v1680_v56, %v1097_v22  ;;  %v1033_v50 = vmul.f32 0.6931472, %v1448_v62  ;;  %v989_v42 = vpop.xlane.xlu1 %988 }
 0x301   :  { %v1126_v61 = vsub.f32 %v1676_v52, %v1094_v63  ;;  %v1043_v60 = vmul.f32 0.6931472, %v1450_v26  ;;  %1459 = vlog2.f32 %v989_v42  ;;  %v983_v45 = vpop.xlane.xlu0 %982 }
 0x302   :  { %1162 = vst.msk [vmem:[%s2122_s5 + $0x18] sm:$0xff] %vm1158_vm3, %v1129_v38  ;;  %v1095_v9 = vadd.f32 %v1033_v50, %v1809_v13  ;;  %1461 = vlog2.f32 %v983_v45 }
 0x303   :  { %v1452_v30 = vpop.eup %1451  ;;  %1159 = vst.msk [vmem:[%s2122_s5] sm:$0xff] %vm1158_vm3, %v1126_v61  ;;  %v1100_v56 = vadd.f32 %v1043_v60, %v1813_v19 }
 0x304   :  { %v1454_v52 = vpop.eup %1453  ;;  %v1127_v2 = vsub.f32 %v1684_v59, %v1095_v9  ;;  %v1045_v35 = vmul.f32 0.6931472, %v1452_v30  ;;  %v985_v8 = vpop.xlane.xlu1 %984 }
 0x305   :  { %v1132_v57 = vsub.f32 %v1689_v1, %v1100_v56  ;;  %v1039_v6 = vmul.f32 0.6931472, %v1454_v52  ;;  %1463 = vlog2.f32 %v985_v8  ;;  %v995_v22 = vpop.xlane.xlu0 %994 }
 0x306   :  { %1160 = vst.msk [vmem:[%s2122_s5 + $0x8] sm:$0xff] %vm1158_vm3, %v1127_v2  ;;  %v1101_v13 = vadd.f32 %v1045_v35, %v1817_v24  ;;  %1465 = vlog2.f32 %v995_v22 }
 0x307   :  { %v1456_v62 = vpop.eup %1455  ;;  %1165 = vst.msk [vmem:[%s2122_s5 + $0x30] sm:$0xff] %vm1158_vm3, %v1132_v57  ;;  %v1098_v59 = vadd.f32 %v1039_v6, %v1821_v32 }
 0x308   :  { %v1458_v1 = vpop.eup %1457  ;;  %v1133_v19 = vsub.f32 %v1692_v4, %v1101_v13  ;;  %v1041_v63 = vmul.f32 0.6931472, %v1456_v62  ;;  %v997_v26 = vpop.xlane.xlu1 %996 }
 0x309   :  { %v1130_v38 = vsub.f32 %v1697_v10, %v1098_v59  ;;  %v1051_v50 = vmul.f32 0.6931472, %v1458_v1  ;;  %1467 = vlog2.f32 %v997_v26  ;;  %v991_v42 = vpop.xlane.xlu0 %990 }
 0x30a   :  { %1166 = vst.msk [vmem:[%s2122_s5 + $0x38] sm:$0xff] %vm1158_vm3, %v1133_v19  ;;  %v1099_v24 = vadd.f32 %v1041_v63, %v1825_v36  ;;  %1469 = vlog2.f32 %v991_v42 }
 0x30b   :  { %v1460_v61 = vpop.eup %1459  ;;  %1163 = vst.msk [vmem:[%s2122_s5 + $0x20] sm:$0xff] %vm1158_vm3, %v1130_v38  ;;  %v1104_v4 = vadd.f32 %v1051_v50, %v1829_v44 }
 0x30c   :  { %v1462_v10 = vpop.eup %1461  ;;  %v1131_v32 = vsub.f32 %v1701_v14, %v1099_v24  ;;  %v1053_v60 = vmul.f32 0.6931472, %v1460_v61  ;;  %v993_v45 = vpop.xlane.xlu1 %992 }
 0x30d   :  { %v1136_v9 = vsub.f32 %v1705_v17, %v1104_v4  ;;  %v1047_v30 = vmul.f32 0.6931472, %v1462_v10  ;;  %1471 = vlog2.f32 %v993_v45  ;;  %v1003_v56 = vpop.xlane.xlu0 %1002 }
 0x30e   :  { %1164 = vst.msk [vmem:[%s2122_s5 + $0x28] sm:$0xff] %vm1158_vm3, %v1131_v32  ;;  %v1105_v36 = vadd.f32 %v1053_v60, %v1833_v49  ;;  %1473 = vlog2.f32 %v1003_v56 }
 0x30f   :  { %v1464_v52 = vpop.eup %1463  ;;  %1169 = vst.msk [vmem:[%s2122_s5 + $0x50] sm:$0xff] %vm1158_vm3, %v1136_v9  ;;  %v1102_v14 = vadd.f32 %v1047_v30, %v1837_v3 }
 0x310   :  { %v1466_v17 = vpop.eup %1465  ;;  %v1137_v44 = vsub.f32 %v1708_v21, %v1105_v36  ;;  %v1049_v2 = vmul.f32 0.6931472, %v1464_v52  ;;  %v1005_v35 = vpop.xlane.xlu1 %1004  ;;  %v2149_v36 = vld [vmem:[#allocation2_spill] sm:$0xff] }
 0x311   :  { %v1134_v8 = vsub.f32 %v1713_v27, %v1102_v14  ;;  %v1059_v57 = vmul.f32 0.6931472, %v1466_v17  ;;  %1475 = vlog2.f32 %v1005_v35  ;;  %v999_v6 = vpop.xlane.xlu0 %998 }
 0x312   :  { %1170 = vst.msk [vmem:[%s2122_s5 + $0x58] sm:$0xff] %vm1158_vm3, %v1137_v44  ;;  %v1103_v49 = vadd.f32 %v1049_v2, %v1841_v7  ;;  %1477 = vlog2.f32 %v999_v6  ;;  %v2150_v2 = vld [vmem:[#allocation3_spill] sm:$0xff]  ;;  %v2151_v6 = vld [vmem:[#allocation4_spill] sm:$0xff] }
 0x313   :  { %v1468_v22 = vpop.eup %1467  ;;  %1167 = vst.msk [vmem:[%s2122_s5 + $0x40] sm:$0xff] %vm1158_vm3, %v1134_v8  ;;  %v1108_v21 = vadd.f32 %v1059_v57, %v1845_v25 }
 0x314   :  { %v1470_v27 = vpop.eup %1469  ;;  %v1135_v3 = vsub.f32 %v1717_v31, %v1103_v49  ;;  %v1061_v13 = vmul.f32 0.6931472, %v1468_v22  ;;  %v1001_v62 = vpop.xlane.xlu1 %1000 }
 0x315   :  { %v1140_v59 = vsub.f32 %v1721_v34, %v1108_v21  ;;  %v1055_v1 = vmul.f32 0.6931472, %v1470_v27  ;;  %1479 = vlog2.f32 %v1001_v62  ;;  %v1011_v19 = vpop.xlane.xlu0 %1010 }
 0x316   :  { %1168 = vst.msk [vmem:[%s2122_s5 + $0x48] sm:$0xff] %vm1158_vm3, %v1135_v3  ;;  %v1109_v7 = vadd.f32 %v1061_v13, %v1849_v29  ;;  %1481 = vlog2.f32 %v1011_v19  ;;  %v2152_v13 = vld [vmem:[#allocation5_spill] sm:$0xff]  ;;  %v2153_v19 = vld [vmem:[#allocation6_spill] sm:$0xff] }
 0x317   :  { %v1472_v63 = vpop.eup %1471  ;;  %1173 = vst.msk [vmem:[%s2122_s5 + $0x70] sm:$0xff] %vm1158_vm3, %v1140_v59  ;;  %v1106_v31 = vadd.f32 %v1055_v1, %v1853_v46 }
 0x318   :  { %v1474_v34 = vpop.eup %1473  ;;  %v1141_v25 = vsub.f32 %v1724_v37, %v1109_v7  ;;  %v1057_v26 = vmul.f32 0.6931472, %v1472_v63  ;;  %v1013_v38 = vpop.xlane.xlu1 %1012 }
 0x319   :  { %v1138_v50 = vsub.f32 %v1729_v43, %v1106_v31  ;;  %v1067_v42 = vmul.f32 0.6931472, %v1474_v34  ;;  %1483 = vlog2.f32 %v1013_v38  ;;  %v1007_v24 = vpop.xlane.xlu0 %1006 }
 0x31a   :  { %1174 = vst.msk [vmem:[%s2122_s5 + $0x78] sm:$0xff] %vm1158_vm3, %v1141_v25  ;;  %v1107_v29 = vadd.f32 %v1057_v26, %v1857_v53  ;;  %1485 = vlog2.f32 %v1007_v24  ;;  %v2154_v26 = vld [vmem:[#allocation7_spill] sm:$0xff]  ;;  %v2155_v24 = vld [vmem:[#allocation8_spill] sm:$0xff] }
 0x31b   :  { %v1476_v61 = vpop.eup %1475  ;;  %1171 = vst.msk [vmem:[%s2122_s5 + $0x60] sm:$0xff] %vm1158_vm3, %v1138_v50  ;;  %v1112_v37 = vadd.f32 %v1067_v42, %v1861_v15 }
 0x31c   :  { %v1478_v43 = vpop.eup %1477  ;;  %v1139_v46 = vsub.f32 %v1733_v47, %v1107_v29  ;;  %v1069_v4 = vmul.f32 0.6931472, %v1476_v61  ;;  %v1009_v10 = vpop.xlane.xlu1 %1008 }
 0x31d   :  { %v1144_v32 = vsub.f32 %v1737_v51, %v1112_v37  ;;  %v1063_v60 = vmul.f32 0.6931472, %v1478_v43  ;;  %1487 = vlog2.f32 %v1009_v10  ;;  %v1019_v45 = vpop.xlane.xlu0 %1018 }
 0x31e   :  { %1172 = vst.msk [vmem:[%s2122_s5 + $0x68] sm:$0xff] %vm1158_vm3, %v1139_v46  ;;  %v1113_v53 = vadd.f32 %v1069_v4, %v1865_v18  ;;  %1489 = vlog2.f32 %v1019_v45  ;;  %v2156_v46 = vld [vmem:[#allocation9_spill] sm:$0xff] }
 0x31f   :  { %v1480_v9 = vpop.eup %1479  ;;  %1177 = vst.msk [vmem:[%s2122_s5 + $0x90] sm:$0xff] %vm1158_vm3, %v1144_v32  ;;  %v1110_v47 = vadd.f32 %v1063_v60, %v1869_v40  ;;  %v2157_v32 = vld [vmem:[#allocation10_spill] sm:$0xff] }
 0x320   :  { %v1482_v51 = vpop.eup %1481  ;;  %v1145_v15 = vsub.f32 %v1740_v55, %v1113_v53  ;;  %v1065_v30 = vmul.f32 0.6931472, %v1480_v9  ;;  %v1021_v56 = vpop.xlane.xlu1 %1020 }
 0x321   :  { %v1142_v52 = vsub.f32 %v2149_v36, %v1110_v47  ;;  %v1075_v14 = vmul.f32 0.6931472, %v1482_v51  ;;  %1491 = vlog2.f32 %v1021_v56  ;;  %v1015_v17 = vpop.xlane.xlu0 %1014  ;;  %v2158_v47 = vld [vmem:[#allocation11_spill] sm:$0xff] }
 0x322   :  { %1178 = vst.msk [vmem:[%s2122_s5 + $0x98] sm:$0xff] %vm1158_vm3, %v1145_v15  ;;  %v1111_v18 = vadd.f32 %v1065_v30, %v1873_v48  ;;  %1493 = vlog2.f32 %v1015_v17  ;;  %v2159_v30 = vld [vmem:[#allocation12_spill] sm:$0xff] }
 0x323   :  { %v1484_v44 = vpop.eup %1483  ;;  %1175 = vst.msk [vmem:[%s2122_s5 + $0x80] sm:$0xff] %vm1158_vm3, %v1142_v52  ;;  %v1116_v55 = vadd.f32 %v1075_v14, %v1877_v11  ;;  %v2160_v14 = vld [vmem:[#allocation13_spill] sm:$0xff] }
 0x324   :  { %v1486_v40 = vpop.eup %1485  ;;  %v1143_v35 = vsub.f32 %v2150_v2, %v1111_v18  ;;  %v1077_v8 = vmul.f32 0.6931472, %v1484_v44  ;;  %v1017_v57 = vpop.xlane.xlu1 %1016  ;;  %v2161_v44 = vld [vmem:[#allocation14_spill] sm:$0xff] }
 0x325   :  { %v1148_v49 = vsub.f32 %v2151_v6, %v1116_v55  ;;  %v1071_v22 = vmul.f32 0.6931472, %v1486_v40  ;;  %1495 = vlog2.f32 %v1017_v57  ;;  %v1023_v21 = vpop.xlane.xlu0 %1022 }
 0x326   :  { %1176 = vst.msk [vmem:[%s2122_s5 + $0x88] sm:$0xff] %vm1158_vm3, %v1143_v35  ;;  %v1117_v48 = vadd.f32 %v1077_v8, %v1881_v28  ;;  %1497 = vlog2.f32 %v1023_v21 }
 0x327   :  { %v1488_v27 = vpop.eup %1487  ;;  %1181 = vst.msk [vmem:[%s2122_s5 + $0xb0] sm:$0xff] %vm1158_vm3, %v1148_v49  ;;  %v1114_v11 = vadd.f32 %v1071_v22, %v1885_v39 }
 0x328   :  { %v1490_v3 = vpop.eup %1489  ;;  %v1149_v62 = vsub.f32 %v2152_v13, %v1117_v48  ;;  %v1073_v59 = vmul.f32 0.6931472, %v1488_v27  ;;  %v1025_v1 = vpop.xlane.xlu1 %1024 }
 0x329   :  { %v1146_v7 = vsub.f32 %v2153_v19, %v1114_v11  ;;  %v1083_v63 = vmul.f32 0.6931472, %v1490_v3  ;;  %1499 = vlog2.f32 %v1025_v1  ;;  %v1027_v31 = vpop.xlane.xlu0 %1026 }
 0x32a   :  { %1182 = vst.msk [vmem:[%s2122_s5 + $0xb8] sm:$0xff] %vm1158_vm3, %v1149_v62  ;;  %v1115_v28 = vadd.f32 %v1073_v59, %v1889_v58  ;;  %1501 = vlog2.f32 %v1027_v31 }
 0x32b   :  { %v1492_v34 = vpop.eup %1491  ;;  %1179 = vst.msk [vmem:[%s2122_s5 + $0xa0] sm:$0xff] %vm1158_vm3, %v1146_v7  ;;  %v1120_v39 = vadd.f32 %v1083_v63, %v1893_v16 }
 0x32c   :  { %v1494_v25 = vpop.eup %1493  ;;  %v1147_v38 = vsub.f32 %v2154_v26, %v1115_v28  ;;  %v1085_v50 = vmul.f32 0.6931472, %v1492_v34  ;;  %v1029_v42 = vpop.xlane.xlu1 %1028 }
 0x32d   :  { %v1152_v29 = vsub.f32 %v2155_v24, %v1120_v39  ;;  %v1079_v61 = vmul.f32 0.6931472, %v1494_v25  ;;  %1503 = vlog2.f32 %v1029_v42 }
 0x32e   :  { %1180 = vst.msk [vmem:[%s2122_s5 + $0xa8] sm:$0xff] %vm1158_vm3, %v1147_v38  ;;  %v1121_v58 = vadd.f32 %v1085_v50, %v1897_v5 }
 0x32f   :  { %v1496_v37 = vpop.eup %1495  ;;  %1185 = vst.msk [vmem:[%s2122_s5 + $0xd0] sm:$0xff] %vm1158_vm3, %v1152_v29  ;;  %v1118_v16 = vadd.f32 %v1079_v61, %v1901_v41 }
 0x330   :  { %v1498_v43 = vpop.eup %1497  ;;  %v1153_v4 = vsub.f32 %v2156_v46, %v1121_v58  ;;  %v1081_v10 = vmul.f32 0.6931472, %v1496_v37 }
 0x331   :  { %v1150_v60 = vsub.f32 %v2157_v32, %v1118_v16  ;;  %v1087_v45 = vmul.f32 0.6931472, %v1498_v43 }
 0x332   :  { %1186 = vst.msk [vmem:[%s2122_s5 + $0xd8] sm:$0xff] %vm1158_vm3, %v1153_v4  ;;  %v1119_v5 = vadd.f32 %v1081_v10, %v1905_v12 }
 0x333   :  { %v1500_v53 = vpop.eup %1499  ;;  %1183 = vst.msk [vmem:[%s2122_s5 + $0xc0] sm:$0xff] %vm1158_vm3, %v1150_v60  ;;  %v1122_v41 = vadd.f32 %v1087_v45, %v1909_v23 }
 0x334   :  { %v1502_v9 = vpop.eup %1501  ;;  %v1151_v51 = vsub.f32 %v2158_v47, %v1119_v5  ;;  %v1089_v15 = vmul.f32 0.6931472, %v1500_v53 }
 0x335   :  { %v1154_v56 = vsub.f32 %v2159_v30, %v1122_v41  ;;  %v1091_v36 = vmul.f32 0.6931472, %v1502_v9 }
 0x336   :  { %1184 = vst.msk [vmem:[%s2122_s5 + $0xc8] sm:$0xff] %vm1158_vm3, %v1151_v51  ;;  %v1123_v12 = vadd.f32 %v1089_v15, %v1913_v33 }
 0x337   :  { %v1504_v52 = vpop.eup %1503  ;;  %1187 = vst.msk [vmem:[%s2122_s5 + $0xe0] sm:$0xff] %vm1158_vm3, %v1154_v56  ;;  %v1124_v23 = vadd.f32 %v1091_v36, %v1917_v54 }
 0x338   :  { %v1155_v17 = vsub.f32 %v2160_v14, %v1123_v12  ;;  %v1093_v18 = vmul.f32 0.6931472, %v1504_v52 }
 0x339   :  { %v1156_v55 = vsub.f32 %v2161_v44, %v1124_v23 }
 0x33a   :  { %1188 = vst.msk [vmem:[%s2122_s5 + $0xe8] sm:$0xff] %vm1158_vm3, %v1155_v17  ;;  %v1125_v33 = vadd.f32 %v1093_v18, %v1921_v0 }
 0x33b   :  { %1189 = vst.msk [vmem:[%s2122_s5 + $0xf0] sm:$0xff] %vm1158_vm3, %v1156_v55 }
 0x33c   :  { %v1157_v40 = vsub.f32 %v1794_v20, %v1125_v33 }
 0x33e   :  { %1190 = vst.msk [vmem:[%s2122_s5 + $0xf8] sm:$0xff] %vm1158_vm3, %v1157_v40 }

// kernel: tpu_custom_call.1
= control target key start
LH: loop header
LB: loop body
LE: loop exit
PB: predicated region body
PF: predicated region fallthrough
CT: control target
= control target key end

     0   :  { %vm156_vm0 = vcmask 261120   ;;  %s2117_s1 = inlined_call_operand.vmem [shape: bf16[32,32], index: 1, kind: input, shape index: {}]   ;;  %s2118_s0 = inlined_call_operand.vmem [shape: bf16[256,32], index: 0, kind: input, shape index: {}]   ;;  %s2119_s3 = inlined_call_operand.vmem [shape: bf16[32,128], index: 3, kind: input, shape index: {}]   ;;  %s2120_s2 = inlined_call_operand.vmem [shape: f32[1,32], index: 2, kind: input, shape index: {}]   ;;  %s2121_s4 = inlined_call_operand.vmem [shape: f32[1,128], index: 4, kind: input, shape index: {}]   ;;  %s2122_s5 = inlined_call_operand.vmem [shape: f32[256,2], index: 5, kind: output, shape index: {}]  }
   0x1   :  { %v1357_v0 = vld [vmem:[%s2117_s1] sm:$0xff]   ;;  %v1358_v1 = vld [vmem:[%s2117_s1 + $0x8] sm:$0xff]   ;;  %v1361_v4 = vld [vmem:[%s2118_s0 + $0x10] sm:$0xff]  }
   0x2   :  { %1285 = vmatprep.subr.bf16.mxu0 %v1357_v0  ;;  %v1359_v2 = vld [vmem:[%s2118_s0] sm:$0xff]   ;;  %v1360_v3 = vld [vmem:[%s2118_s0 + $0x8] sm:$0xff]   ;;  %v1362_v5 = vld [vmem:[%s2118_s0 + $0x18] sm:$0xff]  }
   0x3   :  { %1286 = vmatpush3.bf16.msra.mxu0 %v1357_v0  ;;  %1289 = vmatprep.mubr.msk.bf16.mxu0 %vm156_vm0, %v1359_v2  ;;  %v1363_v6 = vld [vmem:[%s2118_s0 + $0x20] sm:$0xff]   ;;  %v1364_v7 = vld [vmem:[%s2118_s0 + $0x28] sm:$0xff]   ;;  %v1365_v8 = vld [vmem:[%s2118_s0 + $0x30] sm:$0xff]  }
   0x4   :  { %1287 = vmatprep.subr.bf16.mxu0 %v1358_v1  ;;  %v1366_v9 = vld [vmem:[%s2118_s0 + $0x38] sm:$0xff]   ;;  %v1367_v10 = vld [vmem:[%s2118_s0 + $0x40] sm:$0xff]   ;;  %v1368_v11 = vld [vmem:[%s2118_s0 + $0x48] sm:$0xff]  }
   0x5   :  { %v1369_v12 = vld [vmem:[%s2118_s0 + $0x50] sm:$0xff]   ;;  %v1370_v13 = vld [vmem:[%s2118_s0 + $0x58] sm:$0xff]   ;;  %v1371_v14 = vld [vmem:[%s2118_s0 + $0x60] sm:$0xff]  }
   0x6   :  { %v1372_v15 = vld [vmem:[%s2118_s0 + $0x68] sm:$0xff]   ;;  %v1373_v16 = vld [vmem:[%s2118_s0 + $0x70] sm:$0xff]   ;;  %v1374_v17 = vld [vmem:[%s2118_s0 + $0x78] sm:$0xff]  }
   0x7   :  { %1288 = vmatpush3.bf16.msra.mxu0 %v1358_v1  ;;  %v1375_v18 = vld [vmem:[%s2119_s3] sm:$0xff]   ;;  %v1376_v19 = vld [vmem:[%s2119_s3 + $0x8] sm:$0xff]  }
   0x8   :  { %1321 = vmatprep.subr.bf16.mxu1 %v1375_v18  ;;  %v1614_v20 = vld [vmem:[%s2120_s2] ss:$0 sm:$0xff] }
   0x9   :  { %1322 = vmatpush3.bf16.msra.mxu1 %v1375_v18 }
   0xa   :  { %1290 = vmatmul.mubr.msk.bf16.vlgmr.msra.gmra.mrb[0].mxu0 %vm156_vm0, %v1360_v3  ;;  %1323 = vmatprep.subr.bf16.mxu1 %v1376_v19 }
   0xb   :  { %1293 = vmatprep.mubr.msk.bf16.mxu0 %vm156_vm0, %v1361_v4 }
   0xd   :  { %1324 = vmatpush3.bf16.msra.mxu1 %v1376_v19 }
  0x12   :  { %1294 = vmatmul.mubr.msk.bf16.gmra.mrb[4].mxu0 %vm156_vm0, %v1362_v5 }
  0x13   :  { %1297 = vmatprep.mubr.msk.bf16.mxu0 %vm156_vm0, %v1363_v6 }
  0x1a   :  { %1298 = vmatmul.mubr.msk.bf16.gmra.mrb[8].mxu0 %vm156_vm0, %v1364_v7 }
  0x1b   :  { %1301 = vmatprep.mubr.msk.bf16.mxu0 %vm156_vm0, %v1365_v8 }
  0x22   :  { %1302 = vmatmul.mubr.msk.bf16.gmra.mrb[12].mxu0 %vm156_vm0, %v1366_v9 }
  0x23   :  { %1305 = vmatprep.mubr.msk.bf16.mxu0 %vm156_vm0, %v1367_v10 }
  0x2a   :  { %1306 = vmatmul.mubr.msk.bf16.gmra.mrb[16].mxu0 %vm156_vm0, %v1368_v11 }
  0x2b   :  { %1309 = vmatprep.mubr.msk.bf16.mxu0 %vm156_vm0, %v1369_v12 }
  0x32   :  { %1310 = vmatmul.mubr.msk.bf16.gmra.mrb[20].mxu0 %vm156_vm0, %v1370_v13 }
  0x33   :  { %1313 = vmatprep.mubr.msk.bf16.mxu0 %vm156_vm0, %v1371_v14 }
  0x3a   :  { %1314 = vmatmul.mubr.msk.bf16.gmra.mrb[24].mxu0 %vm156_vm0, %v1372_v15 }
  0x3b   :  { %1317 = vmatprep.mubr.msk.bf16.mxu0 %vm156_vm0, %v1373_v16 }
  0x42   :  { %1318 = vmatmul.mubr.msk.bf16.gmra.mrb[28].mxu0 %vm156_vm0, %v1374_v17 }
  0xdd   :  { %v1291_v21 = vpop.f32.mrb[0].mxu0 }
  0xde   :  { %v248_v22 = vadd.f32 %v1291_v21, %v1614_v20  ;;  %v239_v23 = vpop.f32.mrb[1].mxu0 }
  0xdf   :  { %v240_v24 = vadd.f32 %v1614_v20, %v239_v23  ;;  %v1292_v25 = vpop.f32.mrb[2].mxu0 }
  0xe0   :  { %v400_v26 = vmul.f32 0.01, %v248_v22  ;;  %v251_v27 = vadd.f32 %v1292_v25, %v1614_v20  ;;  %v242_v28 = vpop.f32.mrb[3].mxu0  ;;  %vm368_vm1 = vcmp.ge.f32.partialorder %v248_v22, 0.0 }
  0xe1   :  { %v398_v29 = vmul.f32 0.01, %v240_v24  ;;  %v243_v30 = vadd.f32 %v1614_v20, %v242_v28  ;;  %vm366_vm3 = vcmp.ge.f32.partialorder %v240_v24, 0.0 }
  0xe2   :  { %vm369_vm2 = vcmp.ge.f32.partialorder %v251_v27, 0.0  ;;  %v401_v31 = vmul.f32 0.01, %v251_v27  ;;  %v432_v33 = vsel %vm368_vm1, %v248_v22, %v400_v26 }
  0xe3   :  { %v399_v32 = vmul.f32 0.01, %v243_v30  ;;  %vm367_vm4 = vcmp.ge.f32.partialorder %v243_v30, 0.0  ;;  %v430_v37 = vsel %vm366_vm3, %v240_v24, %v398_v29 }
  0xe4   :  { %v433_v34 = vsel %vm369_vm2, %v251_v27, %v401_v31 }
  0xe5   :  { %v463_v35 = vpack.c.bf16 %v433_v34, %v432_v33  ;;  %v1295_v36 = vpop.f32.mrb[4].mxu0  ;;  %v431_v38 = vsel %vm367_vm4, %v243_v30, %v399_v32 }
  0xe6   :  { %v264_v39 = vadd.f32 %v1295_v36, %v1614_v20  ;;  %v255_v40 = vpop.f32.mrb[5].mxu0  ;;  %v462_v41 = vpack.c.bf16 %v431_v38, %v430_v37 }
  0xe7   :  { %v256_v42 = vadd.f32 %v1614_v20, %v255_v40  ;;  %v1296_v43 = vpop.f32.mrb[6].mxu0 }
  0xe8   :  { %v404_v44 = vmul.f32 0.01, %v264_v39  ;;  %v267_v45 = vadd.f32 %v1296_v43, %v1614_v20  ;;  %v258_v46 = vpop.f32.mrb[7].mxu0  ;;  %1325 = vmatprep.mubr.msk.bf16.mxu1 %vm156_vm0, %v462_v41  ;;  %vm372_vm5 = vcmp.ge.f32.partialorder %v264_v39, 0.0 }
  0xe9   :  { %v402_v47 = vmul.f32 0.01, %v256_v42  ;;  %v259_v48 = vadd.f32 %v1614_v20, %v258_v46  ;;  %1326 = vmatmul.mubr.msk.bf16.vlgmr.msra.gmra.mrb[0].mxu1 %vm156_vm0, %v463_v35  ;;  %vm370_vm6 = vcmp.ge.f32.partialorder %v256_v42, 0.0 }
  0xea   :  { %vm373_vm7 = vcmp.ge.f32.partialorder %v267_v45, 0.0  ;;  %v405_v49 = vmul.f32 0.01, %v267_v45  ;;  %v436_v51 = vsel %vm372_vm5, %v264_v39, %v404_v44 }
  0xeb   :  { %vm371_vm8 = vcmp.ge.f32.partialorder %v259_v48, 0.0  ;;  %v403_v50 = vmul.f32 0.01, %v259_v48  ;;  %v434_v53 = vsel %vm370_vm6, %v256_v42, %v402_v47 }
  0xec   :  { %v437_v52 = vsel %vm373_vm7, %v267_v45, %v405_v49 }
  0xed   :  { %v465_v54 = vpack.c.bf16 %v437_v52, %v436_v51  ;;  %v435_v55 = vsel %vm371_vm8, %v259_v48, %v403_v50  ;;  %v1299_v56 = vpop.f32.mrb[8].mxu0 }
  0xee   :  { %v464_v57 = vpack.c.bf16 %v435_v55, %v434_v53  ;;  %v280_v58 = vadd.f32 %v1299_v56, %v1614_v20  ;;  %v271_v59 = vpop.f32.mrb[9].mxu0 }
  0xef   :  { %v272_v60 = vadd.f32 %v1614_v20, %v271_v59  ;;  %v1300_v61 = vpop.f32.mrb[10].mxu0 }
  0xf0   :  { %v408_v62 = vmul.f32 0.01, %v280_v58  ;;  %v283_v63 = vadd.f32 %v1300_v61, %v1614_v20  ;;  %v274_v0 = vpop.f32.mrb[11].mxu0  ;;  %1329 = vmatprep.mubr.msk.bf16.mxu1 %vm156_vm0, %v464_v57  ;;  %vm376_vm9 = vcmp.ge.f32.partialorder %v280_v58, 0.0 }
  0xf1   :  { %v406_v1 = vmul.f32 0.01, %v272_v60  ;;  %v275_v2 = vadd.f32 %v1614_v20, %v274_v0  ;;  %1330 = vmatmul.mubr.msk.bf16.gmra.mrb[4].mxu1 %vm156_vm0, %v465_v54  ;;  %vm374_vm10 = vcmp.ge.f32.partialorder %v272_v60, 0.0 }
  0xf2   :  { %vm377_vm11 = vcmp.ge.f32.partialorder %v283_v63, 0.0  ;;  %v409_v3 = vmul.f32 0.01, %v283_v63  ;;  %v440_v5 = vsel %vm376_vm9, %v280_v58, %v408_v62 }
  0xf3   :  { %vm375_vm12 = vcmp.ge.f32.partialorder %v275_v2, 0.0  ;;  %v407_v4 = vmul.f32 0.01, %v275_v2  ;;  %v438_v7 = vsel %vm374_vm10, %v272_v60, %v406_v1 }
  0xf4   :  { %v441_v6 = vsel %vm377_vm11, %v283_v63, %v409_v3 }
  0xf5   :  { %v467_v8 = vpack.c.bf16 %v441_v6, %v440_v5  ;;  %v439_v9 = vsel %vm375_vm12, %v275_v2, %v407_v4  ;;  %v1303_v10 = vpop.f32.mrb[12].mxu0 }
  0xf6   :  { %v466_v11 = vpack.c.bf16 %v439_v9, %v438_v7  ;;  %v296_v12 = vadd.f32 %v1303_v10, %v1614_v20  ;;  %v287_v13 = vpop.f32.mrb[13].mxu0 }
  0xf7   :  { %v288_v14 = vadd.f32 %v1614_v20, %v287_v13  ;;  %v1304_v15 = vpop.f32.mrb[14].mxu0 }
  0xf8   :  { %v412_v16 = vmul.f32 0.01, %v296_v12  ;;  %v299_v17 = vadd.f32 %v1304_v15, %v1614_v20  ;;  %v290_v18 = vpop.f32.mrb[15].mxu0  ;;  %1333 = vmatprep.mubr.msk.bf16.mxu1 %vm156_vm0, %v466_v11  ;;  %vm380_vm13 = vcmp.ge.f32.partialorder %v296_v12, 0.0 }
  0xf9   :  { %v410_v19 = vmul.f32 0.01, %v288_v14  ;;  %v291_v21 = vadd.f32 %v1614_v20, %v290_v18  ;;  %1334 = vmatmul.mubr.msk.bf16.gmra.mrb[8].mxu1 %vm156_vm0, %v467_v8  ;;  %vm378_vm14 = vcmp.ge.f32.partialorder %v288_v14, 0.0 }
  0xfa   :  { %vm381_vm15 = vcmp.ge.f32.partialorder %v299_v17, 0.0  ;;  %v413_v22 = vmul.f32 0.01, %v299_v17  ;;  %v444_v24 = vsel %vm380_vm13, %v296_v12, %v412_v16 }
  0xfb   :  { %vm379_vm1 = vcmp.ge.f32.partialorder %v291_v21, 0.0  ;;  %v411_v23 = vmul.f32 0.01, %v291_v21  ;;  %v442_v26 = vsel %vm378_vm14, %v288_v14, %v410_v19 }
  0xfc   :  { %v445_v25 = vsel %vm381_vm15, %v299_v17, %v413_v22 }
  0xfd   :  { %v469_v27 = vpack.c.bf16 %v445_v25, %v444_v24  ;;  %v443_v28 = vsel %vm379_vm1, %v291_v21, %v411_v23  ;;  %v1307_v29 = vpop.f32.mrb[16].mxu0 }
  0xfe   :  { %v468_v30 = vpack.c.bf16 %v443_v28, %v442_v26  ;;  %v312_v31 = vadd.f32 %v1307_v29, %v1614_v20  ;;  %v303_v32 = vpop.f32.mrb[17].mxu0 }
  0xff   :  { %v304_v33 = vadd.f32 %v1614_v20, %v303_v32  ;;  %v1308_v34 = vpop.f32.mrb[18].mxu0 }
 0x100   :  { %v416_v35 = vmul.f32 0.01, %v312_v31  ;;  %v315_v36 = vadd.f32 %v1308_v34, %v1614_v20  ;;  %v306_v37 = vpop.f32.mrb[19].mxu0  ;;  %1337 = vmatprep.mubr.msk.bf16.mxu1 %vm156_vm0, %v468_v30  ;;  %vm384_vm2 = vcmp.ge.f32.partialorder %v312_v31, 0.0 }
 0x101   :  { %v414_v38 = vmul.f32 0.01, %v304_v33  ;;  %v307_v39 = vadd.f32 %v1614_v20, %v306_v37  ;;  %1338 = vmatmul.mubr.msk.bf16.gmra.mrb[12].mxu1 %vm156_vm0, %v469_v27  ;;  %vm382_vm3 = vcmp.ge.f32.partialorder %v304_v33, 0.0 }
 0x102   :  { %vm385_vm4 = vcmp.ge.f32.partialorder %v315_v36, 0.0  ;;  %v417_v40 = vmul.f32 0.01, %v315_v36  ;;  %v448_v42 = vsel %vm384_vm2, %v312_v31, %v416_v35 }
 0x103   :  { %vm383_vm5 = vcmp.ge.f32.partialorder %v307_v39, 0.0  ;;  %v415_v41 = vmul.f32 0.01, %v307_v39  ;;  %v446_v44 = vsel %vm382_vm3, %v304_v33, %v414_v38 }
 0x104   :  { %v449_v43 = vsel %vm385_vm4, %v315_v36, %v417_v40 }
 0x105   :  { %v471_v45 = vpack.c.bf16 %v449_v43, %v448_v42  ;;  %v447_v46 = vsel %vm383_vm5, %v307_v39, %v415_v41  ;;  %v1311_v47 = vpop.f32.mrb[20].mxu0 }
 0x106   :  { %v470_v48 = vpack.c.bf16 %v447_v46, %v446_v44  ;;  %v328_v49 = vadd.f32 %v1311_v47, %v1614_v20  ;;  %v319_v50 = vpop.f32.mrb[21].mxu0 }
 0x107   :  { %v320_v51 = vadd.f32 %v1614_v20, %v319_v50  ;;  %v1312_v52 = vpop.f32.mrb[22].mxu0 }
 0x108   :  { %v420_v53 = vmul.f32 0.01, %v328_v49  ;;  %v331_v54 = vadd.f32 %v1312_v52, %v1614_v20  ;;  %v322_v55 = vpop.f32.mrb[23].mxu0  ;;  %1341 = vmatprep.mubr.msk.bf16.mxu1 %vm156_vm0, %v470_v48  ;;  %vm388_vm6 = vcmp.ge.f32.partialorder %v328_v49, 0.0 }
 0x109   :  { %v418_v56 = vmul.f32 0.01, %v320_v51  ;;  %v323_v57 = vadd.f32 %v1614_v20, %v322_v55  ;;  %1342 = vmatmul.mubr.msk.bf16.gmra.mrb[16].mxu1 %vm156_vm0, %v471_v45  ;;  %vm386_vm7 = vcmp.ge.f32.partialorder %v320_v51, 0.0 }
 0x10a   :  { %vm389_vm8 = vcmp.ge.f32.partialorder %v331_v54, 0.0  ;;  %v421_v58 = vmul.f32 0.01, %v331_v54  ;;  %v452_v60 = vsel %vm388_vm6, %v328_v49, %v420_v53 }
 0x10b   :  { %vm387_vm9 = vcmp.ge.f32.partialorder %v323_v57, 0.0  ;;  %v419_v59 = vmul.f32 0.01, %v323_v57  ;;  %v450_v62 = vsel %vm386_vm7, %v320_v51, %v418_v56 }
 0x10c   :  { %v453_v61 = vsel %vm389_vm8, %v331_v54, %v421_v58 }
 0x10d   :  { %v473_v63 = vpack.c.bf16 %v453_v61, %v452_v60  ;;  %v451_v0 = vsel %vm387_vm9, %v323_v57, %v419_v59  ;;  %v1315_v1 = vpop.f32.mrb[24].mxu0 }
 0x10e   :  { %v472_v2 = vpack.c.bf16 %v451_v0, %v450_v62  ;;  %v344_v3 = vadd.f32 %v1315_v1, %v1614_v20  ;;  %v335_v4 = vpop.f32.mrb[25].mxu0 }
 0x10f   :  { %v336_v5 = vadd.f32 %v1614_v20, %v335_v4  ;;  %v1316_v6 = vpop.f32.mrb[26].mxu0 }
 0x110   :  { %v424_v7 = vmul.f32 0.01, %v344_v3  ;;  %v347_v8 = vadd.f32 %v1316_v6, %v1614_v20  ;;  %v338_v9 = vpop.f32.mrb[27].mxu0  ;;  %1345 = vmatprep.mubr.msk.bf16.mxu1 %vm156_vm0, %v472_v2  ;;  %vm392_vm10 = vcmp.ge.f32.partialorder %v344_v3, 0.0 }
 0x111   :  { %v422_v10 = vmul.f32 0.01, %v336_v5  ;;  %v339_v11 = vadd.f32 %v1614_v20, %v338_v9  ;;  %1346 = vmatmul.mubr.msk.bf16.gmra.mrb[20].mxu1 %vm156_vm0, %v473_v63  ;;  %vm390_vm11 = vcmp.ge.f32.partialorder %v336_v5, 0.0 }
 0x112   :  { %vm393_vm12 = vcmp.ge.f32.partialorder %v347_v8, 0.0  ;;  %v425_v12 = vmul.f32 0.01, %v347_v8  ;;  %v456_v14 = vsel %vm392_vm10, %v344_v3, %v424_v7 }
 0x113   :  { %vm391_vm13 = vcmp.ge.f32.partialorder %v339_v11, 0.0  ;;  %v423_v13 = vmul.f32 0.01, %v339_v11  ;;  %v454_v16 = vsel %vm390_vm11, %v336_v5, %v422_v10 }
 0x114   :  { %v457_v15 = vsel %vm393_vm12, %v347_v8, %v425_v12 }
 0x115   :  { %v475_v17 = vpack.c.bf16 %v457_v15, %v456_v14  ;;  %v455_v18 = vsel %vm391_vm13, %v339_v11, %v423_v13  ;;  %v1319_v19 = vpop.f32.mrb[28].mxu0 }
 0x116   :  { %v474_v21 = vpack.c.bf16 %v455_v18, %v454_v16  ;;  %v360_v22 = vadd.f32 %v1319_v19, %v1614_v20  ;;  %v351_v23 = vpop.f32.mrb[29].mxu0 }
 0x117   :  { %v352_v24 = vadd.f32 %v1614_v20, %v351_v23  ;;  %v1320_v25 = vpop.f32.mrb[30].mxu0 }
 0x118   :  { %v428_v26 = vmul.f32 0.01, %v360_v22  ;;  %v363_v27 = vadd.f32 %v1320_v25, %v1614_v20  ;;  %v354_v28 = vpop.f32.mrb[31].mxu0  ;;  %1349 = vmatprep.mubr.msk.bf16.mxu1 %vm156_vm0, %v474_v21  ;;  %vm396_vm14 = vcmp.ge.f32.partialorder %v360_v22, 0.0 }
 0x119   :  { %v426_v29 = vmul.f32 0.01, %v352_v24  ;;  %v355_v30 = vadd.f32 %v1614_v20, %v354_v28  ;;  %1350 = vmatmul.mubr.msk.bf16.gmra.mrb[24].mxu1 %vm156_vm0, %v475_v17  ;;  %vm394_vm15 = vcmp.ge.f32.partialorder %v352_v24, 0.0  ;;  %v1667_v20 = vld [vmem:[%s2121_s4] ss:$0 sm:$0xff] }
 0x11a   :  { %vm397_vm1 = vcmp.ge.f32.partialorder %v363_v27, 0.0  ;;  %v429_v31 = vmul.f32 0.01, %v363_v27  ;;  %v460_v33 = vsel %vm396_vm14, %v360_v22, %v428_v26 }
 0x11b   :  { %vm395_vm2 = vcmp.ge.f32.partialorder %v355_v30, 0.0  ;;  %v427_v32 = vmul.f32 0.01, %v355_v30  ;;  %v458_v35 = vsel %vm394_vm15, %v352_v24, %v426_v29 }
 0x11c   :  { %v461_v34 = vsel %vm397_vm1, %v363_v27, %v429_v31 }
 0x11d   :  { %v477_v36 = vpack.c.bf16 %v461_v34, %v460_v33  ;;  %v459_v37 = vsel %vm395_vm2, %v355_v30, %v427_v32 }
 0x11e   :  { %v476_v38 = vpack.c.bf16 %v459_v37, %v458_v35 }
 0x120   :  { %1353 = vmatprep.mubr.msk.bf16.mxu1 %vm156_vm0, %v476_v38 }
 0x121   :  { %1354 = vmatmul.mubr.msk.bf16.gmra.mrb[28].mxu1 %vm156_vm0, %v477_v36 }
 0x1bc   :  { %v1327_v39 = vpop.f32.mrb[0].mxu1 }
 0x1bd   :  { %v592_v40 = vadd.f32 %v1327_v39, %v1667_v20  ;;  %v583_v41 = vpop.f32.mrb[1].mxu1 }
 0x1be   :  { %v584_v42 = vadd.f32 %v1667_v20, %v583_v41  ;;  %v1328_v43 = vpop.f32.mrb[2].mxu1 }
 0x1bf   :  { %v744_v44 = vmul.f32 0.01, %v592_v40  ;;  %v595_v45 = vadd.f32 %v1328_v43, %v1667_v20  ;;  %v586_v46 = vpop.f32.mrb[3].mxu1  ;;  %vm712_vm3 = vcmp.ge.f32.partialorder %v592_v40, 0.0 }
 0x1c0   :  { %v742_v47 = vmul.f32 0.01, %v584_v42  ;;  %v587_v48 = vadd.f32 %v1667_v20, %v586_v46  ;;  %vm710_vm0 = vcmp.ge.f32.partialorder %v584_v42, 0.0 }
 0x1c1   :  { %v745_v49 = vmul.f32 0.01, %v595_v45  ;;  %v1673_v50 = vsel %vm712_vm3, %v592_v40, %v744_v44  ;;  %vm713_vm4 = vcmp.ge.f32.partialorder %v595_v45, 0.0 }
 0x1c2   :  { %v743_v51 = vmul.f32 0.01, %v587_v48  ;;  %810 = vmax.xlane.f32.xlu1 %v1673_v50  ;;  %v1676_v52 = vsel %vm710_vm0, %v584_v42, %v742_v47  ;;  %vm711_vm5 = vcmp.ge.f32.partialorder %v587_v48, 0.0 }
 0x1c3   :  { %806 = vmax.xlane.f32.xlu0 %v1676_v52  ;;  %v1680_v56 = vsel %vm713_vm4, %v595_v45, %v745_v49 }
 0x1c4   :  { %v1331_v53 = vpop.f32.mrb[4].mxu1  ;;  %v1684_v59 = vsel %vm711_vm5, %v587_v48, %v743_v51 }
 0x1c5   :  { %v608_v54 = vadd.f32 %v1331_v53, %v1667_v20  ;;  %v599_v55 = vpop.f32.mrb[5].mxu1 }
 0x1c6   :  { %v600_v57 = vadd.f32 %v1667_v20, %v599_v55  ;;  %812 = vmax.xlane.f32.xlu1 %v1680_v56  ;;  %v1332_v58 = vpop.f32.mrb[6].mxu1 }
 0x1c7   :  { %v748_v60 = vmul.f32 0.01, %v608_v54  ;;  %v611_v61 = vadd.f32 %v1332_v58, %v1667_v20  ;;  %v602_v62 = vpop.f32.mrb[7].mxu1  ;;  %808 = vmax.xlane.f32.xlu0 %v1684_v59  ;;  %vm716_vm6 = vcmp.ge.f32.partialorder %v608_v54, 0.0 }
 0x1c8   :  { %v603_v63 = vadd.f32 %v1667_v20, %v602_v62  ;;  %v746_v2 = vmul.f32 0.01, %v600_v57  ;;  %vm714_vm8 = vcmp.ge.f32.partialorder %v600_v57, 0.0 }
 0x1c9   :  { %v749_v0 = vmul.f32 0.01, %v611_v61  ;;  %v1689_v1 = vsel %vm716_vm6, %v608_v54, %v748_v60  ;;  %vm717_vm7 = vcmp.ge.f32.partialorder %v611_v61, 0.0 }
 0x1ca   :  { %v747_v3 = vmul.f32 0.01, %v603_v63  ;;  %vm715_vm9 = vcmp.ge.f32.partialorder %v603_v63, 0.0  ;;  %v1697_v10 = vsel %vm714_vm8, %v600_v57, %v746_v2 }
 0x1cb   :  { %818 = vmax.xlane.f32.xlu0 %v1689_v1  ;;  %v1692_v4 = vsel %vm717_vm7, %v611_v61, %v749_v0 }
 0x1cc   :  { %820 = vmax.xlane.f32.xlu1 %v1692_v4  ;;  %v1335_v5 = vpop.f32.mrb[8].mxu1  ;;  %v1701_v14 = vsel %vm715_vm9, %v603_v63, %v747_v3 }
 0x1cd   :  { %v624_v6 = vadd.f32 %v1335_v5, %v1667_v20  ;;  %v615_v7 = vpop.f32.mrb[9].mxu1 }
 0x1ce   :  { %v616_v8 = vadd.f32 %v1667_v20, %v615_v7  ;;  %v1336_v9 = vpop.f32.mrb[10].mxu1 }
 0x1cf   :  { %v752_v11 = vmul.f32 0.01, %v624_v6  ;;  %v627_v12 = vadd.f32 %v1336_v9, %v1667_v20  ;;  %v618_v13 = vpop.f32.mrb[11].mxu1  ;;  %814 = vmax.xlane.f32.xlu0 %v1697_v10  ;;  %vm720_vm10 = vcmp.ge.f32.partialorder %v624_v6, 0.0 }
 0x1d0   :  { %v619_v15 = vadd.f32 %v1667_v20, %v618_v13  ;;  %816 = vmax.xlane.f32.xlu1 %v1701_v14  ;;  %v750_v18 = vmul.f32 0.01, %v616_v8  ;;  %vm718_vm12 = vcmp.ge.f32.partialorder %v616_v8, 0.0 }
 0x1d1   :  { %v753_v16 = vmul.f32 0.01, %v627_v12  ;;  %v1705_v17 = vsel %vm720_vm10, %v624_v6, %v752_v11  ;;  %vm721_vm11 = vcmp.ge.f32.partialorder %v627_v12, 0.0 }
 0x1d2   :  { %v751_v19 = vmul.f32 0.01, %v619_v15  ;;  %vm719_vm13 = vcmp.ge.f32.partialorder %v619_v15, 0.0  ;;  %v1713_v27 = vsel %vm718_vm12, %v616_v8, %v750_v18 }
 0x1d3   :  { %826 = vmax.xlane.f32.xlu0 %v1705_v17  ;;  %v1708_v21 = vsel %vm721_vm11, %v627_v12, %v753_v16 }
 0x1d4   :  { %v1339_v22 = vpop.f32.mrb[12].mxu1  ;;  %828 = vmax.xlane.f32.xlu1 %v1708_v21  ;;  %v1717_v31 = vsel %vm719_vm13, %v619_v15, %v751_v19 }
 0x1d5   :  { %v640_v23 = vadd.f32 %v1339_v22, %v1667_v20  ;;  %v631_v24 = vpop.f32.mrb[13].mxu1 }
 0x1d6   :  { %v632_v25 = vadd.f32 %v1667_v20, %v631_v24  ;;  %v1340_v26 = vpop.f32.mrb[14].mxu1 }
 0x1d7   :  { %v756_v28 = vmul.f32 0.01, %v640_v23  ;;  %v643_v29 = vadd.f32 %v1340_v26, %v1667_v20  ;;  %v634_v30 = vpop.f32.mrb[15].mxu1  ;;  %822 = vmax.xlane.f32.xlu0 %v1713_v27  ;;  %vm724_vm14 = vcmp.ge.f32.partialorder %v640_v23, 0.0 }
 0x1d8   :  { %v635_v32 = vadd.f32 %v1667_v20, %v634_v30  ;;  %824 = vmax.xlane.f32.xlu1 %v1717_v31  ;;  %v754_v35 = vmul.f32 0.01, %v632_v25  ;;  %vm722_vm1 = vcmp.ge.f32.partialorder %v632_v25, 0.0 }
 0x1d9   :  { %v757_v33 = vmul.f32 0.01, %v643_v29  ;;  %v1721_v34 = vsel %vm724_vm14, %v640_v23, %v756_v28  ;;  %vm725_vm15 = vcmp.ge.f32.partialorder %v643_v29, 0.0 }
 0x1da   :  { %v755_v36 = vmul.f32 0.01, %v635_v32  ;;  %vm723_vm2 = vcmp.ge.f32.partialorder %v635_v32, 0.0  ;;  %v1729_v43 = vsel %vm722_vm1, %v632_v25, %v754_v35 }
 0x1db   :  { %834 = vmax.xlane.f32.xlu0 %v1721_v34  ;;  %v1724_v37 = vsel %vm725_vm15, %v643_v29, %v757_v33 }
 0x1dc   :  { %v1343_v38 = vpop.f32.mrb[16].mxu1  ;;  %836 = vmax.xlane.f32.xlu1 %v1724_v37  ;;  %v1733_v47 = vsel %vm723_vm2, %v635_v32, %v755_v36 }
 0x1dd   :  { %v656_v39 = vadd.f32 %v1343_v38, %v1667_v20  ;;  %v647_v40 = vpop.f32.mrb[17].mxu1 }
 0x1de   :  { %v648_v41 = vadd.f32 %v1667_v20, %v647_v40  ;;  %v1344_v42 = vpop.f32.mrb[18].mxu1 }
 0x1df   :  { %v760_v44 = vmul.f32 0.01, %v656_v39  ;;  %v659_v45 = vadd.f32 %v1344_v42, %v1667_v20  ;;  %v650_v46 = vpop.f32.mrb[19].mxu1  ;;  %830 = vmax.xlane.f32.xlu0 %v1729_v43  ;;  %vm728_vm3 = vcmp.ge.f32.partialorder %v656_v39, 0.0 }
 0x1e0   :  { %v651_v48 = vadd.f32 %v1667_v20, %v650_v46  ;;  %832 = vmax.xlane.f32.xlu1 %v1733_v47  ;;  %v758_v53 = vmul.f32 0.01, %v648_v41  ;;  %vm726_vm4 = vcmp.ge.f32.partialorder %v648_v41, 0.0 }
 0x1e1   :  { %v761_v49 = vmul.f32 0.01, %v659_v45  ;;  %v1737_v51 = vsel %vm728_vm3, %v656_v39, %v760_v44  ;;  %vm729_vm0 = vcmp.ge.f32.partialorder %v659_v45, 0.0  ;;  %vm1158_vm3 = vcmask 15360  }
 0x1e2   :  { %v759_v54 = vmul.f32 0.01, %v651_v48  ;;  %vm727_vm5 = vcmp.ge.f32.partialorder %v651_v48, 0.0  ;;  %v1745_v63 = vsel %vm726_vm4, %v648_v41, %v758_v53 }
 0x1e3   :  { %842 = vmax.xlane.f32.xlu0 %v1737_v51  ;;  %v1740_v55 = vsel %vm729_vm0, %v659_v45, %v761_v49  ;;  %2136 = vst [vmem:[#allocation2_spill] sm:$0xff] %v1745_v63 }
 0x1e4   :  { %v1347_v57 = vpop.f32.mrb[20].mxu1  ;;  %844 = vmax.xlane.f32.xlu1 %v1740_v55  ;;  %v1749_v5 = vsel %vm727_vm5, %v651_v48, %v759_v54 }
 0x1e5   :  { %v672_v58 = vadd.f32 %v1347_v57, %v1667_v20  ;;  %v663_v60 = vpop.f32.mrb[21].mxu1  ;;  %2137 = vst [vmem:[#allocation3_spill] sm:$0xff] %v1749_v5 }
 0x1e6   :  { %v664_v61 = vadd.f32 %v1667_v20, %v663_v60  ;;  %v1348_v62 = vpop.f32.mrb[22].mxu1 }
 0x1e7   :  { %v764_v0 = vmul.f32 0.01, %v672_v58  ;;  %v675_v2 = vadd.f32 %v1348_v62, %v1667_v20  ;;  %v666_v3 = vpop.f32.mrb[23].mxu1  ;;  %838 = vmax.xlane.f32.xlu0 %v1745_v63  ;;  %vm732_vm6 = vcmp.ge.f32.partialorder %v672_v58, 0.0 }
 0x1e8   :  { %v667_v6 = vadd.f32 %v1667_v20, %v666_v3  ;;  %840 = vmax.xlane.f32.xlu1 %v1749_v5  ;;  %v762_v9 = vmul.f32 0.01, %v664_v61  ;;  %vm730_vm8 = vcmp.ge.f32.partialorder %v664_v61, 0.0 }
 0x1e9   :  { %v765_v7 = vmul.f32 0.01, %v675_v2  ;;  %v1753_v8 = vsel %vm732_vm6, %v672_v58, %v764_v0  ;;  %vm733_vm7 = vcmp.ge.f32.partialorder %v675_v2, 0.0 }
 0x1ea   :  { %2138 = vst [vmem:[#allocation4_spill] sm:$0xff] %v1753_v8  ;;  %v763_v11 = vmul.f32 0.01, %v667_v6  ;;  %vm731_vm9 = vcmp.ge.f32.partialorder %v667_v6, 0.0  ;;  %v1761_v22 = vsel %vm730_vm8, %v664_v61, %v762_v9 }
 0x1eb   :  { %850 = vmax.xlane.f32.xlu0 %v1753_v8  ;;  %v1756_v12 = vsel %vm733_vm7, %v675_v2, %v765_v7  ;;  %2140 = vst [vmem:[#allocation6_spill] sm:$0xff] %v1761_v22 }
 0x1ec   :  { %2139 = vst [vmem:[#allocation5_spill] sm:$0xff] %v1756_v12  ;;  %v1351_v13 = vpop.f32.mrb[24].mxu1  ;;  %852 = vmax.xlane.f32.xlu1 %v1756_v12  ;;  %v1765_v26 = vsel %vm731_vm9, %v667_v6, %v763_v11 }
 0x1ed   :  { %v688_v15 = vadd.f32 %v1351_v13, %v1667_v20  ;;  %v679_v16 = vpop.f32.mrb[25].mxu1  ;;  %2141 = vst [vmem:[#allocation7_spill] sm:$0xff] %v1765_v26 }
 0x1ee   :  { %v680_v18 = vadd.f32 %v1667_v20, %v679_v16  ;;  %v1352_v19 = vpop.f32.mrb[26].mxu1 }
 0x1ef   :  { %v768_v23 = vmul.f32 0.01, %v688_v15  ;;  %v691_v24 = vadd.f32 %v1352_v19, %v1667_v20  ;;  %v682_v25 = vpop.f32.mrb[27].mxu1  ;;  %846 = vmax.xlane.f32.xlu0 %v1761_v22  ;;  %vm736_vm10 = vcmp.ge.f32.partialorder %v688_v15, 0.0 }
 0x1f0   :  { %v683_v28 = vadd.f32 %v1667_v20, %v682_v25  ;;  %848 = vmax.xlane.f32.xlu1 %v1765_v26  ;;  %v766_v32 = vmul.f32 0.01, %v680_v18  ;;  %vm734_vm12 = vcmp.ge.f32.partialorder %v680_v18, 0.0 }
 0x1f1   :  { %v769_v29 = vmul.f32 0.01, %v691_v24  ;;  %v1769_v30 = vsel %vm736_vm10, %v688_v15, %v768_v23  ;;  %vm737_vm11 = vcmp.ge.f32.partialorder %v691_v24, 0.0 }
 0x1f2   :  { %2142 = vst [vmem:[#allocation8_spill] sm:$0xff] %v1769_v30  ;;  %v767_v33 = vmul.f32 0.01, %v683_v28  ;;  %vm735_vm13 = vcmp.ge.f32.partialorder %v683_v28, 0.0  ;;  %v1777_v42 = vsel %vm734_vm12, %v680_v18, %v766_v32 }
 0x1f3   :  { %858 = vmax.xlane.f32.xlu0 %v1769_v30  ;;  %v1772_v35 = vsel %vm737_vm11, %v691_v24, %v769_v29  ;;  %2144 = vst [vmem:[#allocation10_spill] sm:$0xff] %v1777_v42 }
 0x1f4   :  { %2143 = vst [vmem:[#allocation9_spill] sm:$0xff] %v1772_v35  ;;  %v1355_v36 = vpop.f32.mrb[28].mxu1  ;;  %860 = vmax.xlane.f32.xlu1 %v1772_v35  ;;  %v1780_v45 = vsel %vm735_vm13, %v683_v28, %v767_v33 }
 0x1f5   :  { %v695_v38 = vpop.f32.mrb[29].mxu1  ;;  %v704_v39 = vadd.f32 %v1355_v36, %v1667_v20  ;;  %2145 = vst [vmem:[#allocation11_spill] sm:$0xff] %v1780_v45 }
 0x1f6   :  { %v696_v40 = vadd.f32 %v1667_v20, %v695_v38  ;;  %v1356_v41 = vpop.f32.mrb[30].mxu1 }
 0x1f7   :  { %v698_v44 = vpop.f32.mrb[31].mxu1  ;;  %854 = vmax.xlane.f32.xlu0 %v1777_v42  ;;  %v707_v48 = vadd.f32 %v1356_v41, %v1667_v20  ;;  %v772_v53 = vmul.f32 0.01, %v704_v39  ;;  %vm740_vm1 = vcmp.ge.f32.partialorder %v704_v39, 0.0 }
 0x1f8   :  { %v770_v46 = vmul.f32 0.01, %v696_v40  ;;  %v699_v49 = vadd.f32 %v1667_v20, %v698_v44  ;;  %856 = vmax.xlane.f32.xlu1 %v1780_v45  ;;  %vm738_vm14 = vcmp.ge.f32.partialorder %v696_v40, 0.0 }
 0x1f9   :  { %v773_v58 = vmul.f32 0.01, %v707_v48  ;;  %vm741_vm2 = vcmp.ge.f32.partialorder %v707_v48, 0.0  ;;  %v1791_v61 = vsel %vm740_vm1, %v704_v39, %v772_v53 }
 0x1fa   :  { %v771_v54 = vmul.f32 0.01, %v699_v49  ;;  %v1785_v57 = vsel %vm738_vm14, %v696_v40, %v770_v46  ;;  %vm739_vm15 = vcmp.ge.f32.partialorder %v699_v49, 0.0  ;;  %2148 = vst [vmem:[#allocation14_spill] sm:$0xff] %v1791_v61 }
 0x1fb   :  { %2146 = vst [vmem:[#allocation12_spill] sm:$0xff] %v1785_v57  ;;  %862 = vmax.xlane.f32.xlu0 %v1785_v57  ;;  %v1794_v20 = vsel %vm741_vm2, %v707_v48, %v773_v58 }
 0x1fc   :  { %v1788_v60 = vsel %vm739_vm15, %v699_v49, %v771_v54 }
 0x1fd   :  { %2147 = vst [vmem:[#allocation13_spill] sm:$0xff] %v1788_v60  ;;  %864 = vmax.xlane.f32.xlu1 %v1788_v60 }
 0x1ff   :  { %866 = vmax.xlane.f32.xlu0 %v1791_v61 }
 0x201   :  { %868 = vmax.xlane.f32.xlu1 %v1794_v20 }
 0x24f   :  { %v1797_v62 = vpop.xlane.xlu1 %810 }
 0x250   :  { %v872_v0 = vsub.f32 %v1673_v50, %v1797_v62  ;;  %v1801_v2 = vpop.xlane.xlu0 %806 }
 0x251   :  { %v870_v3 = vsub.f32 %v1676_v52, %v1801_v2 }
 0x252   :  { %v906_v6 = vmul.f32 1.442695, %v872_v0 }
 0x253   :  { %v902_v7 = vmul.f32 1.442695, %v870_v3  ;;  %v1805_v9 = vpop.xlane.xlu1 %812 }
 0x254   :  { %1377 = vpow2.f32 %v906_v6  ;;  %v873_v11 = vsub.f32 %v1680_v56, %v1805_v9  ;;  %v1809_v13 = vpop.xlane.xlu0 %808 }
 0x255   :  { %v871_v15 = vsub.f32 %v1684_v59, %v1809_v13  ;;  %1379 = vpow2.f32 %v902_v7 }
 0x256   :  { %v908_v16 = vmul.f32 1.442695, %v873_v11 }
 0x257   :  { %v904_v18 = vmul.f32 1.442695, %v871_v15 }
 0x258   :  { %1381 = vpow2.f32 %v908_v16  ;;  %v1813_v19 = vpop.xlane.xlu0 %818 }
 0x259   :  { %v876_v23 = vsub.f32 %v1689_v1, %v1813_v19  ;;  %v1817_v24 = vpop.xlane.xlu1 %820  ;;  %1383 = vpow2.f32 %v904_v18 }
 0x25a   :  { %v877_v25 = vsub.f32 %v1692_v4, %v1817_v24 }
 0x25b   :  { %v914_v28 = vmul.f32 1.442695, %v876_v23 }
 0x25c   :  { %v916_v29 = vmul.f32 1.442695, %v877_v25  ;;  %v1821_v32 = vpop.xlane.xlu0 %814 }
 0x25d   :  { %1385 = vpow2.f32 %v914_v28  ;;  %v874_v33 = vsub.f32 %v1697_v10, %v1821_v32  ;;  %v1825_v36 = vpop.xlane.xlu1 %816 }
 0x25e   :  { %v1378_v38 = vpop.eup %1377  ;;  %v875_v39 = vsub.f32 %v1701_v14, %v1825_v36  ;;  %1387 = vpow2.f32 %v916_v29 }
 0x25f   :  { %v910_v40 = vmul.f32 1.442695, %v874_v33  ;;  %970 = vadd.xlane.f32.xlu0 %v1378_v38  ;;  %v1380_v46 = vpop.eup %1379 }
 0x260   :  { %v912_v41 = vmul.f32 1.442695, %v875_v39  ;;  %v1829_v44 = vpop.xlane.xlu0 %826 }
 0x261   :  { %1389 = vpow2.f32 %v910_v40  ;;  %v880_v48 = vsub.f32 %v1705_v17, %v1829_v44  ;;  %v1833_v49 = vpop.xlane.xlu1 %828 }
 0x262   :  { %v1382_v53 = vpop.eup %1381  ;;  %v881_v54 = vsub.f32 %v1708_v21, %v1833_v49  ;;  %1391 = vpow2.f32 %v912_v41 }
 0x263   :  { %v922_v58 = vmul.f32 1.442695, %v880_v48  ;;  %972 = vadd.xlane.f32.xlu1 %v1382_v53  ;;  %966 = vadd.xlane.f32.xlu0 %v1380_v46  ;;  %v1384_v11 = vpop.eup %1383 }
 0x264   :  { %v924_v0 = vmul.f32 1.442695, %v881_v54  ;;  %v1837_v3 = vpop.xlane.xlu0 %822 }
 0x265   :  { %1393 = vpow2.f32 %v922_v58  ;;  %v878_v6 = vsub.f32 %v1713_v27, %v1837_v3  ;;  %v1841_v7 = vpop.xlane.xlu1 %824 }
 0x266   :  { %v879_v15 = vsub.f32 %v1717_v31, %v1841_v7  ;;  %1395 = vpow2.f32 %v924_v0 }
 0x267   :  { %v1386_v16 = vpop.eup %1385  ;;  %v918_v18 = vmul.f32 1.442695, %v878_v6  ;;  %968 = vadd.xlane.f32.xlu1 %v1384_v11 }
 0x268   :  { %v920_v23 = vmul.f32 1.442695, %v879_v15  ;;  %978 = vadd.xlane.f32.xlu0 %v1386_v16  ;;  %v1845_v25 = vpop.xlane.xlu0 %834  ;;  %v1388_v33 = vpop.eup %1387 }
 0x269   :  { %1397 = vpow2.f32 %v918_v18  ;;  %v884_v28 = vsub.f32 %v1721_v34, %v1845_v25  ;;  %v1849_v29 = vpop.xlane.xlu1 %836 }
 0x26a   :  { %v885_v38 = vsub.f32 %v1724_v37, %v1849_v29  ;;  %1399 = vpow2.f32 %v920_v23 }
 0x26b   :  { %v1390_v39 = vpop.eup %1389  ;;  %v930_v40 = vmul.f32 1.442695, %v884_v28  ;;  %980 = vadd.xlane.f32.xlu1 %v1388_v33 }
 0x26c   :  { %v932_v41 = vmul.f32 1.442695, %v885_v38  ;;  %974 = vadd.xlane.f32.xlu0 %v1390_v39  ;;  %v1853_v46 = vpop.xlane.xlu0 %830  ;;  %v1392_v54 = vpop.eup %1391 }
 0x26d   :  { %1401 = vpow2.f32 %v930_v40  ;;  %v882_v48 = vsub.f32 %v1729_v43, %v1853_v46  ;;  %v1857_v53 = vpop.xlane.xlu1 %832 }
 0x26e   :  { %v883_v58 = vsub.f32 %v1733_v47, %v1857_v53  ;;  %1403 = vpow2.f32 %v932_v41 }
 0x26f   :  { %v1394_v0 = vpop.eup %1393  ;;  %v926_v6 = vmul.f32 1.442695, %v882_v48  ;;  %976 = vadd.xlane.f32.xlu1 %v1392_v54 }
 0x270   :  { %v928_v11 = vmul.f32 1.442695, %v883_v58  ;;  %986 = vadd.xlane.f32.xlu0 %v1394_v0  ;;  %v1861_v15 = vpop.xlane.xlu0 %842  ;;  %v1396_v23 = vpop.eup %1395 }
 0x271   :  { %1405 = vpow2.f32 %v926_v6  ;;  %v888_v16 = vsub.f32 %v1737_v51, %v1861_v15  ;;  %v1865_v18 = vpop.xlane.xlu1 %844 }
 0x272   :  { %v889_v28 = vsub.f32 %v1740_v55, %v1865_v18  ;;  %1407 = vpow2.f32 %v928_v11 }
 0x273   :  { %v1398_v33 = vpop.eup %1397  ;;  %v938_v38 = vmul.f32 1.442695, %v888_v16  ;;  %988 = vadd.xlane.f32.xlu1 %v1396_v23 }
 0x274   :  { %v940_v39 = vmul.f32 1.442695, %v889_v28  ;;  %982 = vadd.xlane.f32.xlu0 %v1398_v33  ;;  %v1869_v40 = vpop.xlane.xlu0 %838  ;;  %v1400_v54 = vpop.eup %1399 }
 0x275   :  { %1409 = vpow2.f32 %v938_v38  ;;  %v886_v41 = vsub.f32 %v1745_v63, %v1869_v40  ;;  %v1873_v48 = vpop.xlane.xlu1 %840 }
 0x276   :  { %v887_v58 = vsub.f32 %v1749_v5, %v1873_v48  ;;  %1411 = vpow2.f32 %v940_v39 }
 0x277   :  { %v1402_v0 = vpop.eup %1401  ;;  %v934_v6 = vmul.f32 1.442695, %v886_v41  ;;  %984 = vadd.xlane.f32.xlu1 %v1400_v54 }
 0x278   :  { %v936_v16 = vmul.f32 1.442695, %v887_v58  ;;  %994 = vadd.xlane.f32.xlu0 %v1402_v0  ;;  %v1877_v11 = vpop.xlane.xlu0 %850  ;;  %v1404_v33 = vpop.eup %1403 }
 0x279   :  { %1413 = vpow2.f32 %v934_v6  ;;  %v892_v23 = vsub.f32 %v1753_v8, %v1877_v11  ;;  %v1881_v28 = vpop.xlane.xlu1 %852 }
 0x27a   :  { %v893_v38 = vsub.f32 %v1756_v12, %v1881_v28  ;;  %1415 = vpow2.f32 %v936_v16 }
 0x27b   :  { %v1406_v63 = vpop.eup %1405  ;;  %v946_v5 = vmul.f32 1.442695, %v892_v23  ;;  %996 = vadd.xlane.f32.xlu1 %v1404_v33 }
 0x27c   :  { %v948_v41 = vmul.f32 1.442695, %v893_v38  ;;  %990 = vadd.xlane.f32.xlu0 %v1406_v63  ;;  %v1885_v39 = vpop.xlane.xlu0 %846  ;;  %v1408_v0 = vpop.eup %1407 }
 0x27d   :  { %1417 = vpow2.f32 %v946_v5  ;;  %v890_v54 = vsub.f32 %v1761_v22, %v1885_v39  ;;  %v1889_v58 = vpop.xlane.xlu1 %848 }
 0x27e   :  { %v891_v6 = vsub.f32 %v1765_v26, %v1889_v58  ;;  %1419 = vpow2.f32 %v948_v41 }
 0x27f   :  { %v1410_v8 = vpop.eup %1409  ;;  %v942_v12 = vmul.f32 1.442695, %v890_v54  ;;  %992 = vadd.xlane.f32.xlu1 %v1408_v0 }
 0x280   :  { %v944_v23 = vmul.f32 1.442695, %v891_v6  ;;  %1002 = vadd.xlane.f32.xlu0 %v1410_v8  ;;  %v1893_v16 = vpop.xlane.xlu0 %858  ;;  %v1412_v33 = vpop.eup %1411 }
 0x281   :  { %1421 = vpow2.f32 %v942_v12  ;;  %v896_v63 = vsub.f32 %v1769_v30, %v1893_v16  ;;  %v1897_v5 = vpop.xlane.xlu1 %860 }
 0x282   :  { %v897_v38 = vsub.f32 %v1772_v35, %v1897_v5  ;;  %1423 = vpow2.f32 %v944_v23 }
 0x283   :  { %v1414_v22 = vpop.eup %1413  ;;  %v954_v26 = vmul.f32 1.442695, %v896_v63  ;;  %1004 = vadd.xlane.f32.xlu1 %v1412_v33 }
 0x284   :  { %v956_v54 = vmul.f32 1.442695, %v897_v38  ;;  %998 = vadd.xlane.f32.xlu0 %v1414_v22  ;;  %v1901_v41 = vpop.xlane.xlu0 %854  ;;  %v1416_v0 = vpop.eup %1415 }
 0x285   :  { %1425 = vpow2.f32 %v954_v26  ;;  %v894_v8 = vsub.f32 %v1777_v42, %v1901_v41  ;;  %v1905_v12 = vpop.xlane.xlu1 %856 }
 0x286   :  { %v895_v6 = vsub.f32 %v1780_v45, %v1905_v12  ;;  %1427 = vpow2.f32 %v956_v54 }
 0x287   :  { %v1418_v30 = vpop.eup %1417  ;;  %v950_v35 = vmul.f32 1.442695, %v894_v8  ;;  %1000 = vadd.xlane.f32.xlu1 %v1416_v0 }
 0x288   :  { %v952_v63 = vmul.f32 1.442695, %v895_v6  ;;  %1010 = vadd.xlane.f32.xlu0 %v1418_v30  ;;  %v1909_v23 = vpop.xlane.xlu0 %862  ;;  %v1420_v26 = vpop.eup %1419 }
 0x289   :  { %1429 = vpow2.f32 %v950_v35  ;;  %v898_v22 = vsub.f32 %v1785_v57, %v1909_v23 }
 0x28a   :  { %v1913_v33 = vpop.xlane.xlu1 %864  ;;  %1431 = vpow2.f32 %v952_v63 }
 0x28b   :  { %v1422_v38 = vpop.eup %1421  ;;  %v958_v42 = vmul.f32 1.442695, %v898_v22  ;;  %v899_v45 = vsub.f32 %v1788_v60, %v1913_v33  ;;  %1012 = vadd.xlane.f32.xlu1 %v1420_v26 }
 0x28c   :  { %1006 = vadd.xlane.f32.xlu0 %v1422_v38  ;;  %v1917_v54 = vpop.xlane.xlu0 %866  ;;  %v1424_v8 = vpop.eup %1423 }
 0x28d   :  { %1433 = vpow2.f32 %v958_v42  ;;  %v960_v30 = vmul.f32 1.442695, %v899_v45  ;;  %v900_v35 = vsub.f32 %v1791_v61, %v1917_v54 }
 0x28e   :  { %v1921_v0 = vpop.xlane.xlu1 %868 }
 0x28f   :  { %v1426_v6 = vpop.eup %1425  ;;  %1435 = vpow2.f32 %v960_v30  ;;  %v962_v57 = vmul.f32 1.442695, %v900_v35  ;;  %v901_v22 = vsub.f32 %v1794_v20, %v1921_v0  ;;  %1008 = vadd.xlane.f32.xlu1 %v1424_v8 }
 0x290   :  { %1018 = vadd.xlane.f32.xlu0 %v1426_v6  ;;  %v1428_v26 = vpop.eup %1427 }
 0x291   :  { %1437 = vpow2.f32 %v962_v57  ;;  %v964_v63 = vmul.f32 1.442695, %v901_v22 }
 0x293   :  { %v1430_v38 = vpop.eup %1429  ;;  %1439 = vpow2.f32 %v964_v63  ;;  %1020 = vadd.xlane.f32.xlu1 %v1428_v26 }
 0x294   :  { %1014 = vadd.xlane.f32.xlu0 %v1430_v38  ;;  %v1432_v42 = vpop.eup %1431 }
 0x297   :  { %v1434_v45 = vpop.eup %1433  ;;  %1016 = vadd.xlane.f32.xlu1 %v1432_v42 }
 0x298   :  { %1022 = vadd.xlane.f32.xlu0 %v1434_v45 }
 0x299   :  { %v1436_v61 = vpop.eup %1435 }
 0x29b   :  { %v1438_v60 = vpop.eup %1437  ;;  %1024 = vadd.xlane.f32.xlu1 %v1436_v61 }
 0x29c   :  { %1026 = vadd.xlane.f32.xlu0 %v1438_v60 }
 0x29d   :  { %v1440_v30 = vpop.eup %1439 }
 0x29f   :  { %1028 = vadd.xlane.f32.xlu1 %v1440_v30 }
 0x2ec   :  { %v971_v35 = vpop.xlane.xlu0 %970 }
 0x2ed   :  { %1441 = vlog2.f32 %v971_v35 }
 0x2f0   :  { %v973_v8 = vpop.xlane.xlu1 %972  ;;  %v967_v57 = vpop.xlane.xlu0 %966 }
 0x2f1   :  { %1443 = vlog2.f32 %v973_v8 }
 0x2f2   :  { %1445 = vlog2.f32 %v967_v57 }
 0x2f4   :  { %v969_v6 = vpop.xlane.xlu1 %968 }
 0x2f5   :  { %1447 = vlog2.f32 %v969_v6  ;;  %v979_v22 = vpop.xlane.xlu0 %978 }
 0x2f6   :  { %1449 = vlog2.f32 %v979_v22 }
 0x2f7   :  { %v1442_v63 = vpop.eup %1441 }
 0x2f8   :  { %v1035_v26 = vmul.f32 0.6931472, %v1442_v63  ;;  %v981_v38 = vpop.xlane.xlu1 %980 }
 0x2f9   :  { %1451 = vlog2.f32 %v981_v38  ;;  %v975_v42 = vpop.xlane.xlu0 %974 }
 0x2fa   :  { %v1096_v61 = vadd.f32 %v1035_v26, %v1797_v62  ;;  %1453 = vlog2.f32 %v975_v42 }
 0x2fb   :  { %v1444_v60 = vpop.eup %1443 }
 0x2fc   :  { %v1446_v45 = vpop.eup %1445  ;;  %v1128_v30 = vsub.f32 %v1673_v50, %v1096_v61  ;;  %v1037_v35 = vmul.f32 0.6931472, %v1444_v60  ;;  %v977_v8 = vpop.xlane.xlu1 %976 }
 0x2fd   :  { %v1031_v57 = vmul.f32 0.6931472, %v1446_v45  ;;  %1455 = vlog2.f32 %v977_v8  ;;  %v987_v6 = vpop.xlane.xlu0 %986 }
 0x2fe   :  { %1161 = vst.msk [vmem:[%s2122_s5 + $0x10] sm:$0xff] %vm1158_vm3, %v1128_v30  ;;  %v1097_v22 = vadd.f32 %v1037_v35, %v1805_v9  ;;  %1457 = vlog2.f32 %v987_v6 }
 0x2ff   :  { %v1448_v62 = vpop.eup %1447  ;;  %v1094_v63 = vadd.f32 %v1031_v57, %v1801_v2 }
 0x300   :  { %v1450_v26 = vpop.eup %1449  ;;  %v1129_v38 = vsub.f32 %v1680_v56, %v1097_v22  ;;  %v1033_v50 = vmul.f32 0.6931472, %v1448_v62  ;;  %v989_v42 = vpop.xlane.xlu1 %988 }
 0x301   :  { %v1126_v61 = vsub.f32 %v1676_v52, %v1094_v63  ;;  %v1043_v60 = vmul.f32 0.6931472, %v1450_v26  ;;  %1459 = vlog2.f32 %v989_v42  ;;  %v983_v45 = vpop.xlane.xlu0 %982 }
 0x302   :  { %1162 = vst.msk [vmem:[%s2122_s5 + $0x18] sm:$0xff] %vm1158_vm3, %v1129_v38  ;;  %v1095_v9 = vadd.f32 %v1033_v50, %v1809_v13  ;;  %1461 = vlog2.f32 %v983_v45 }
 0x303   :  { %v1452_v30 = vpop.eup %1451  ;;  %1159 = vst.msk [vmem:[%s2122_s5] sm:$0xff] %vm1158_vm3, %v1126_v61  ;;  %v1100_v56 = vadd.f32 %v1043_v60, %v1813_v19 }
 0x304   :  { %v1454_v52 = vpop.eup %1453  ;;  %v1127_v2 = vsub.f32 %v1684_v59, %v1095_v9  ;;  %v1045_v35 = vmul.f32 0.6931472, %v1452_v30  ;;  %v985_v8 = vpop.xlane.xlu1 %984 }
 0x305   :  { %v1132_v57 = vsub.f32 %v1689_v1, %v1100_v56  ;;  %v1039_v6 = vmul.f32 0.6931472, %v1454_v52  ;;  %1463 = vlog2.f32 %v985_v8  ;;  %v995_v22 = vpop.xlane.xlu0 %994 }
 0x306   :  { %1160 = vst.msk [vmem:[%s2122_s5 + $0x8] sm:$0xff] %vm1158_vm3, %v1127_v2  ;;  %v1101_v13 = vadd.f32 %v1045_v35, %v1817_v24  ;;  %1465 = vlog2.f32 %v995_v22 }
 0x307   :  { %v1456_v62 = vpop.eup %1455  ;;  %1165 = vst.msk [vmem:[%s2122_s5 + $0x30] sm:$0xff] %vm1158_vm3, %v1132_v57  ;;  %v1098_v59 = vadd.f32 %v1039_v6, %v1821_v32 }
 0x308   :  { %v1458_v1 = vpop.eup %1457  ;;  %v1133_v19 = vsub.f32 %v1692_v4, %v1101_v13  ;;  %v1041_v63 = vmul.f32 0.6931472, %v1456_v62  ;;  %v997_v26 = vpop.xlane.xlu1 %996 }
 0x309   :  { %v1130_v38 = vsub.f32 %v1697_v10, %v1098_v59  ;;  %v1051_v50 = vmul.f32 0.6931472, %v1458_v1  ;;  %1467 = vlog2.f32 %v997_v26  ;;  %v991_v42 = vpop.xlane.xlu0 %990 }
 0x30a   :  { %1166 = vst.msk [vmem:[%s2122_s5 + $0x38] sm:$0xff] %vm1158_vm3, %v1133_v19  ;;  %v1099_v24 = vadd.f32 %v1041_v63, %v1825_v36  ;;  %1469 = vlog2.f32 %v991_v42 }
 0x30b   :  { %v1460_v61 = vpop.eup %1459  ;;  %1163 = vst.msk [vmem:[%s2122_s5 + $0x20] sm:$0xff] %vm1158_vm3, %v1130_v38  ;;  %v1104_v4 = vadd.f32 %v1051_v50, %v1829_v44 }
 0x30c   :  { %v1462_v10 = vpop.eup %1461  ;;  %v1131_v32 = vsub.f32 %v1701_v14, %v1099_v24  ;;  %v1053_v60 = vmul.f32 0.6931472, %v1460_v61  ;;  %v993_v45 = vpop.xlane.xlu1 %992 }
 0x30d   :  { %v1136_v9 = vsub.f32 %v1705_v17, %v1104_v4  ;;  %v1047_v30 = vmul.f32 0.6931472, %v1462_v10  ;;  %1471 = vlog2.f32 %v993_v45  ;;  %v1003_v56 = vpop.xlane.xlu0 %1002 }
 0x30e   :  { %1164 = vst.msk [vmem:[%s2122_s5 + $0x28] sm:$0xff] %vm1158_vm3, %v1131_v32  ;;  %v1105_v36 = vadd.f32 %v1053_v60, %v1833_v49  ;;  %1473 = vlog2.f32 %v1003_v56 }
 0x30f   :  { %v1464_v52 = vpop.eup %1463  ;;  %1169 = vst.msk [vmem:[%s2122_s5 + $0x50] sm:$0xff] %vm1158_vm3, %v1136_v9  ;;  %v1102_v14 = vadd.f32 %v1047_v30, %v1837_v3 }
 0x310   :  { %v1466_v17 = vpop.eup %1465  ;;  %v1137_v44 = vsub.f32 %v1708_v21, %v1105_v36  ;;  %v1049_v2 = vmul.f32 0.6931472, %v1464_v52  ;;  %v1005_v35 = vpop.xlane.xlu1 %1004  ;;  %v2149_v36 = vld [vmem:[#allocation2_spill] sm:$0xff] }
 0x311   :  { %v1134_v8 = vsub.f32 %v1713_v27, %v1102_v14  ;;  %v1059_v57 = vmul.f32 0.6931472, %v1466_v17  ;;  %1475 = vlog2.f32 %v1005_v35  ;;  %v999_v6 = vpop.xlane.xlu0 %998 }
 0x312   :  { %1170 = vst.msk [vmem:[%s2122_s5 + $0x58] sm:$0xff] %vm1158_vm3, %v1137_v44  ;;  %v1103_v49 = vadd.f32 %v1049_v2, %v1841_v7  ;;  %1477 = vlog2.f32 %v999_v6  ;;  %v2150_v2 = vld [vmem:[#allocation3_spill] sm:$0xff]  ;;  %v2151_v6 = vld [vmem:[#allocation4_spill] sm:$0xff] }
 0x313   :  { %v1468_v22 = vpop.eup %1467  ;;  %1167 = vst.msk [vmem:[%s2122_s5 + $0x40] sm:$0xff] %vm1158_vm3, %v1134_v8  ;;  %v1108_v21 = vadd.f32 %v1059_v57, %v1845_v25 }
 0x314   :  { %v1470_v27 = vpop.eup %1469  ;;  %v1135_v3 = vsub.f32 %v1717_v31, %v1103_v49  ;;  %v1061_v13 = vmul.f32 0.6931472, %v1468_v22  ;;  %v1001_v62 = vpop.xlane.xlu1 %1000 }
 0x315   :  { %v1140_v59 = vsub.f32 %v1721_v34, %v1108_v21  ;;  %v1055_v1 = vmul.f32 0.6931472, %v1470_v27  ;;  %1479 = vlog2.f32 %v1001_v62  ;;  %v1011_v19 = vpop.xlane.xlu0 %1010 }
 0x316   :  { %1168 = vst.msk [vmem:[%s2122_s5 + $0x48] sm:$0xff] %vm1158_vm3, %v1135_v3  ;;  %v1109_v7 = vadd.f32 %v1061_v13, %v1849_v29  ;;  %1481 = vlog2.f32 %v1011_v19  ;;  %v2152_v13 = vld [vmem:[#allocation5_spill] sm:$0xff]  ;;  %v2153_v19 = vld [vmem:[#allocation6_spill] sm:$0xff] }
 0x317   :  { %v1472_v63 = vpop.eup %1471  ;;  %1173 = vst.msk [vmem:[%s2122_s5 + $0x70] sm:$0xff] %vm1158_vm3, %v1140_v59  ;;  %v1106_v31 = vadd.f32 %v1055_v1, %v1853_v46 }
 0x318   :  { %v1474_v34 = vpop.eup %1473  ;;  %v1141_v25 = vsub.f32 %v1724_v37, %v1109_v7  ;;  %v1057_v26 = vmul.f32 0.6931472, %v1472_v63  ;;  %v1013_v38 = vpop.xlane.xlu1 %1012 }
 0x319   :  { %v1138_v50 = vsub.f32 %v1729_v43, %v1106_v31  ;;  %v1067_v42 = vmul.f32 0.6931472, %v1474_v34  ;;  %1483 = vlog2.f32 %v1013_v38  ;;  %v1007_v24 = vpop.xlane.xlu0 %1006 }
 0x31a   :  { %1174 = vst.msk [vmem:[%s2122_s5 + $0x78] sm:$0xff] %vm1158_vm3, %v1141_v25  ;;  %v1107_v29 = vadd.f32 %v1057_v26, %v1857_v53  ;;  %1485 = vlog2.f32 %v1007_v24  ;;  %v2154_v26 = vld [vmem:[#allocation7_spill] sm:$0xff]  ;;  %v2155_v24 = vld [vmem:[#allocation8_spill] sm:$0xff] }
 0x31b   :  { %v1476_v61 = vpop.eup %1475  ;;  %1171 = vst.msk [vmem:[%s2122_s5 + $0x60] sm:$0xff] %vm1158_vm3, %v1138_v50  ;;  %v1112_v37 = vadd.f32 %v1067_v42, %v1861_v15 }
 0x31c   :  { %v1478_v43 = vpop.eup %1477  ;;  %v1139_v46 = vsub.f32 %v1733_v47, %v1107_v29  ;;  %v1069_v4 = vmul.f32 0.6931472, %v1476_v61  ;;  %v1009_v10 = vpop.xlane.xlu1 %1008 }
 0x31d   :  { %v1144_v32 = vsub.f32 %v1737_v51, %v1112_v37  ;;  %v1063_v60 = vmul.f32 0.6931472, %v1478_v43  ;;  %1487 = vlog2.f32 %v1009_v10  ;;  %v1019_v45 = vpop.xlane.xlu0 %1018 }
 0x31e   :  { %1172 = vst.msk [vmem:[%s2122_s5 + $0x68] sm:$0xff] %vm1158_vm3, %v1139_v46  ;;  %v1113_v53 = vadd.f32 %v1069_v4, %v1865_v18  ;;  %1489 = vlog2.f32 %v1019_v45  ;;  %v2156_v46 = vld [vmem:[#allocation9_spill] sm:$0xff] }
 0x31f   :  { %v1480_v9 = vpop.eup %1479  ;;  %1177 = vst.msk [vmem:[%s2122_s5 + $0x90] sm:$0xff] %vm1158_vm3, %v1144_v32  ;;  %v1110_v47 = vadd.f32 %v1063_v60, %v1869_v40  ;;  %v2157_v32 = vld [vmem:[#allocation10_spill] sm:$0xff] }
 0x320   :  { %v1482_v51 = vpop.eup %1481  ;;  %v1145_v15 = vsub.f32 %v1740_v55, %v1113_v53  ;;  %v1065_v30 = vmul.f32 0.6931472, %v1480_v9  ;;  %v1021_v56 = vpop.xlane.xlu1 %1020 }
 0x321   :  { %v1142_v52 = vsub.f32 %v2149_v36, %v1110_v47  ;;  %v1075_v14 = vmul.f32 0.6931472, %v1482_v51  ;;  %1491 = vlog2.f32 %v1021_v56  ;;  %v1015_v17 = vpop.xlane.xlu0 %1014  ;;  %v2158_v47 = vld [vmem:[#allocation11_spill] sm:$0xff] }
 0x322   :  { %1178 = vst.msk [vmem:[%s2122_s5 + $0x98] sm:$0xff] %vm1158_vm3, %v1145_v15  ;;  %v1111_v18 = vadd.f32 %v1065_v30, %v1873_v48  ;;  %1493 = vlog2.f32 %v1015_v17  ;;  %v2159_v30 = vld [vmem:[#allocation12_spill] sm:$0xff] }
 0x323   :  { %v1484_v44 = vpop.eup %1483  ;;  %1175 = vst.msk [vmem:[%s2122_s5 + $0x80] sm:$0xff] %vm1158_vm3, %v1142_v52  ;;  %v1116_v55 = vadd.f32 %v1075_v14, %v1877_v11  ;;  %v2160_v14 = vld [vmem:[#allocation13_spill] sm:$0xff] }
 0x324   :  { %v1486_v40 = vpop.eup %1485  ;;  %v1143_v35 = vsub.f32 %v2150_v2, %v1111_v18  ;;  %v1077_v8 = vmul.f32 0.6931472, %v1484_v44  ;;  %v1017_v57 = vpop.xlane.xlu1 %1016  ;;  %v2161_v44 = vld [vmem:[#allocation14_spill] sm:$0xff] }
 0x325   :  { %v1148_v49 = vsub.f32 %v2151_v6, %v1116_v55  ;;  %v1071_v22 = vmul.f32 0.6931472, %v1486_v40  ;;  %1495 = vlog2.f32 %v1017_v57  ;;  %v1023_v21 = vpop.xlane.xlu0 %1022 }
 0x326   :  { %1176 = vst.msk [vmem:[%s2122_s5 + $0x88] sm:$0xff] %vm1158_vm3, %v1143_v35  ;;  %v1117_v48 = vadd.f32 %v1077_v8, %v1881_v28  ;;  %1497 = vlog2.f32 %v1023_v21 }
 0x327   :  { %v1488_v27 = vpop.eup %1487  ;;  %1181 = vst.msk [vmem:[%s2122_s5 + $0xb0] sm:$0xff] %vm1158_vm3, %v1148_v49  ;;  %v1114_v11 = vadd.f32 %v1071_v22, %v1885_v39 }
 0x328   :  { %v1490_v3 = vpop.eup %1489  ;;  %v1149_v62 = vsub.f32 %v2152_v13, %v1117_v48  ;;  %v1073_v59 = vmul.f32 0.6931472, %v1488_v27  ;;  %v1025_v1 = vpop.xlane.xlu1 %1024 }
 0x329   :  { %v1146_v7 = vsub.f32 %v2153_v19, %v1114_v11  ;;  %v1083_v63 = vmul.f32 0.6931472, %v1490_v3  ;;  %1499 = vlog2.f32 %v1025_v1  ;;  %v1027_v31 = vpop.xlane.xlu0 %1026 }
 0x32a   :  { %1182 = vst.msk [vmem:[%s2122_s5 + $0xb8] sm:$0xff] %vm1158_vm3, %v1149_v62  ;;  %v1115_v28 = vadd.f32 %v1073_v59, %v1889_v58  ;;  %1501 = vlog2.f32 %v1027_v31 }
 0x32b   :  { %v1492_v34 = vpop.eup %1491  ;;  %1179 = vst.msk [vmem:[%s2122_s5 + $0xa0] sm:$0xff] %vm1158_vm3, %v1146_v7  ;;  %v1120_v39 = vadd.f32 %v1083_v63, %v1893_v16 }
 0x32c   :  { %v1494_v25 = vpop.eup %1493  ;;  %v1147_v38 = vsub.f32 %v2154_v26, %v1115_v28  ;;  %v1085_v50 = vmul.f32 0.6931472, %v1492_v34  ;;  %v1029_v42 = vpop.xlane.xlu1 %1028 }
 0x32d   :  { %v1152_v29 = vsub.f32 %v2155_v24, %v1120_v39  ;;  %v1079_v61 = vmul.f32 0.6931472, %v1494_v25  ;;  %1503 = vlog2.f32 %v1029_v42 }
 0x32e   :  { %1180 = vst.msk [vmem:[%s2122_s5 + $0xa8] sm:$0xff] %vm1158_vm3, %v1147_v38  ;;  %v1121_v58 = vadd.f32 %v1085_v50, %v1897_v5 }
 0x32f   :  { %v1496_v37 = vpop.eup %1495  ;;  %1185 = vst.msk [vmem:[%s2122_s5 + $0xd0] sm:$0xff] %vm1158_vm3, %v1152_v29  ;;  %v1118_v16 = vadd.f32 %v1079_v61, %v1901_v41 }
 0x330   :  { %v1498_v43 = vpop.eup %1497  ;;  %v1153_v4 = vsub.f32 %v2156_v46, %v1121_v58  ;;  %v1081_v10 = vmul.f32 0.6931472, %v1496_v37 }
 0x331   :  { %v1150_v60 = vsub.f32 %v2157_v32, %v1118_v16  ;;  %v1087_v45 = vmul.f32 0.6931472, %v1498_v43 }
 0x332   :  { %1186 = vst.msk [vmem:[%s2122_s5 + $0xd8] sm:$0xff] %vm1158_vm3, %v1153_v4  ;;  %v1119_v5 = vadd.f32 %v1081_v10, %v1905_v12 }
 0x333   :  { %v1500_v53 = vpop.eup %1499  ;;  %1183 = vst.msk [vmem:[%s2122_s5 + $0xc0] sm:$0xff] %vm1158_vm3, %v1150_v60  ;;  %v1122_v41 = vadd.f32 %v1087_v45, %v1909_v23 }
 0x334   :  { %v1502_v9 = vpop.eup %1501  ;;  %v1151_v51 = vsub.f32 %v2158_v47, %v1119_v5  ;;  %v1089_v15 = vmul.f32 0.6931472, %v1500_v53 }
 0x335   :  { %v1154_v56 = vsub.f32 %v2159_v30, %v1122_v41  ;;  %v1091_v36 = vmul.f32 0.6931472, %v1502_v9 }
 0x336   :  { %1184 = vst.msk [vmem:[%s2122_s5 + $0xc8] sm:$0xff] %vm1158_vm3, %v1151_v51  ;;  %v1123_v12 = vadd.f32 %v1089_v15, %v1913_v33 }
 0x337   :  { %v1504_v52 = vpop.eup %1503  ;;  %1187 = vst.msk [vmem:[%s2122_s5 + $0xe0] sm:$0xff] %vm1158_vm3, %v1154_v56  ;;  %v1124_v23 = vadd.f32 %v1091_v36, %v1917_v54 }
 0x338   :  { %v1155_v17 = vsub.f32 %v2160_v14, %v1123_v12  ;;  %v1093_v18 = vmul.f32 0.6931472, %v1504_v52 }
 0x339   :  { %v1156_v55 = vsub.f32 %v2161_v44, %v1124_v23 }
 0x33a   :  { %1188 = vst.msk [vmem:[%s2122_s5 + $0xe8] sm:$0xff] %vm1158_vm3, %v1155_v17  ;;  %v1125_v33 = vadd.f32 %v1093_v18, %v1921_v0 }
 0x33b   :  { %1189 = vst.msk [vmem:[%s2122_s5 + $0xf0] sm:$0xff] %vm1158_vm3, %v1156_v55 }
 0x33c   :  { %v1157_v40 = vsub.f32 %v1794_v20, %v1125_v33 }
 0x33e   :  { %1190 = vst.msk [vmem:[%s2122_s5 + $0xf8] sm:$0xff] %vm1158_vm3, %v1157_v40 }

</bundles_post_ra>
